<compile_context>
chip_gen: v7x
topology: tpu7x:2x2x1
jax: 0.10.0
libtpu: 0.0.40
codegen_flags: <defaults>
</compile_context>

<pallas_src>
import functools

import jax
import jax.numpy as jnp
from jax.experimental import pallas as pl
from jax.experimental.pallas import tpu as pltpu

EPS = 1e-6


# --------------------- stage 1: frozen backbone + global average pool ---------------------

def _feature_pool_kernel(xp_ref, ws_ref, bs_ref, wf_ref, bf_ref, o_ref, *, bt, n, ic):
    """One batch tile: patch features -> SiLU -> 1280-ch features -> SiLU -> mean over patches.

    xp_ref: (bt*n, K1) bf16 image patches
    ws/bs:  (K1, C1) bf16 / (1, C1) f32     stand-in patch embed          (frozen)
    wf/bf:  (C1, 1280) bf16 / (1, 1280) f32 stand-in feature head         (frozen)
    o_ref:  (1, bt, 1280) f32               pooled features for this tile
    """
    rows = ic * n                       # rows per chunk (whole images only)
    n_chunks = bt // ic
    inv_n = jnp.float32(1.0 / n)

    def chunk(c, carry):
        r0 = c * rows
        o0 = c * ic
        if not isinstance(c, int):      # alignment hints only make sense on traced indices
            r0 = pl.multiple_of(r0, rows)
            o0 = pl.multiple_of(o0, ic)

        x = xp_ref[pl.ds(r0, rows), :]                                        # (rows, K1) bf16
        h = jnp.dot(x, ws_ref[...], preferred_element_type=jnp.float32) + bs_ref[...]
        h = h.astype(jnp.bfloat16)
        h = h * jax.nn.sigmoid(h)                                             # SiLU, bf16
        f = jnp.dot(h, wf_ref[...], preferred_element_type=jnp.float32) + bf_ref[...]
        f = f.astype(jnp.bfloat16)
        f = f * jax.nn.sigmoid(f)                                             # (rows, 1280) bf16

        f32f = f.astype(jnp.float32)
        if ic == 1:
            pooled = jnp.sum(f32f, axis=0, keepdims=True) * inv_n             # (1, 1280)
        else:
            pooled = jnp.sum(f32f.reshape(ic, n, f32f.shape[-1]), axis=1) * inv_n
        o_ref[0, pl.ds(o0, ic), :] = pooled
        return carry

    if n_chunks == 1:
        chunk(0, 0)
    else:
        jax.lax.fori_loop(0, n_chunks, chunk, 0, unroll=(n_chunks <= 8))


# --------------------- stage 2: vision_proj + RMSNorm (whole batch, once) ---------------------

def _proj_norm_kernel(pooled_ref, wp_ref, bp_ref, g_ref, o_ref):
    """pooled (B, 1280) f32 -> Linear(1280, image_dim) -> RMSNorm -> (B, image_dim) f32."""
    pooled = pooled_ref[...].astype(jnp.bfloat16)
    proj = jnp.dot(pooled, wp_ref[...], preferred_element_type=jnp.float32) + bp_ref[...]
    ms = jnp.mean(proj * proj, axis=-1, keepdims=True)
    o_ref[...] = (proj * jax.lax.rsqrt(ms + EPS) * g_ref[...]).astype(o_ref.dtype)


# ----------------------------- wrapper / specs -----------------------------

def _extract_patches(images, patch):
    """Space-to-depth: (B, C, H, W) -> (B, N, C*patch*patch)."""
    B, C, H, W = images.shape
    assert H % patch == 0 and W % patch == 0, "spatial dims must be divisible by patch"
    x = images.reshape(B, C, H // patch, patch, W // patch, patch)
    x = x.transpose(0, 2, 4, 1, 3, 5)
    return x.reshape(B, (H // patch) * (W // patch), C * patch * patch)


def _pick_batch_tile(B, N, *, max_rows=2048):
    # Cap at B//2 so the grid has >= 2 steps (both v7x TensorCores get work).
    cap = max(1, B // 2)
    bt = 1
    for cand in range(1, cap + 1):
        if B % cand == 0 and cand * N <= max_rows:
            bt = cand
    return bt


def _pick_images_per_chunk(bt, N, *, max_chunk_rows=256):
    # Whole images per chunk so each chunk's reduction lands in distinct pooled rows.
    limit = max(N, max_chunk_rows)
    ic = 1
    for cand in range(1, bt + 1):
        if bt % cand == 0 and cand * N <= limit:
            ic = cand
    return ic


def _tile_bytes(rows, cols, itemsize):
    r = ((max(rows, 1) + 7) // 8) * 8
    c = ((max(cols, 1) + 127) // 128) * 128
    return r * c * itemsize


def multimodal_encode(images, params, *, patch=4, batch_tile=None):
    """MultiModalEncoder.forward(images) -> (B, image_dim)."""
    xp3 = _extract_patches(images, patch).astype(jnp.bfloat16)
    B, N, K1 = xp3.shape
    xp = xp3.reshape(B * N, K1)                     # 2-D activations: simple lane-dense DMA tiles
    stem_dim = params["w_stem"].shape[1]
    feat_dim = params["w_feat"].shape[1]
    image_dim = params["w_proj"].shape[1]

    bt = batch_tile if batch_tile is not None else _pick_batch_tile(B, N)
    assert B % bt == 0
    assert (bt * N) % 8 == 0, "batch_tile * n_patches must be a multiple of 8"
    ic = _pick_images_per_chunk(bt, N)
    n_tiles = B // bt
    rows = ic * N

    # ---- stage 1: backbone + pool -> pooled (B, 1280) f32 ----
    vmem1 = (2 * _tile_bytes(bt * N, K1, 2)                                   # xp, double-buffered
             + 2 * (_tile_bytes(K1, stem_dim, 2) + _tile_bytes(1, stem_dim, 4)
                    + _tile_bytes(stem_dim, feat_dim, 2) + _tile_bytes(1, feat_dim, 4))
             + 2 * _tile_bytes(bt, feat_dim, 4)                               # pooled out tile
             + _tile_bytes(rows, stem_dim, 4) + _tile_bytes(rows, stem_dim, 2)
             + _tile_bytes(rows, feat_dim, 4) + _tile_bytes(rows, feat_dim, 2))
    vmem1 = int(min(max(vmem1 + (6 << 20), 16 << 20), 64 << 20))

    flops1 = 2 * B * N * (K1 * stem_dim + stem_dim * feat_dim)
    trans1 = B * N * (stem_dim + feat_dim)
    bytes1 = (2 * B * N * K1
              + 2 * (K1 * stem_dim + stem_dim * feat_dim) + 4 * (stem_dim + feat_dim)
              + 4 * B * feat_dim)

    pooled = pl.pallas_call(
        functools.partial(_feature_pool_kernel, bt=bt, n=N, ic=ic),
        out_shape=jax.ShapeDtypeStruct((n_tiles, bt, feat_dim), jnp.float32),
        grid=(n_tiles,),
        in_specs=[
            pl.BlockSpec((bt * N, K1), lambda b: (b, 0)),
            pl.BlockSpec((K1, stem_dim), lambda b: (0, 0)),
            pl.BlockSpec((1, stem_dim), lambda b: (0, 0)),
            pl.BlockSpec((stem_dim, feat_dim), lambda b: (0, 0)),
            pl.BlockSpec((1, feat_dim), lambda b: (0, 0)),
        ],
        out_specs=pl.BlockSpec((1, bt, feat_dim), lambda b: (b, 0, 0)),
        compiler_params=pltpu.CompilerParams(
            dimension_semantics=("parallel",),
            vmem_limit_bytes=vmem1,
        ),
        cost_estimate=pl.CostEstimate(flops=int(flops1), transcendentals=int(trans1),
                                      bytes_accessed=int(bytes1)),
    )(xp, params["w_stem"], params["b_stem"], params["w_feat"], params["b_feat"])

    pooled = pooled.reshape(B, feat_dim)

    # ---- stage 2: vision_proj + RMSNorm, once over the whole batch (M = B) ----
    vmem2 = 2 * (_tile_bytes(B, feat_dim, 4) + _tile_bytes(feat_dim, image_dim, 2)
                 + 2 * _tile_bytes(1, image_dim, 4) + _tile_bytes(B, image_dim, 4))
    vmem2 = int(min(max(vmem2 + (4 << 20), 8 << 20), 64 << 20))

    out = pl.pallas_call(
        _proj_norm_kernel,
        out_shape=jax.ShapeDtypeStruct((B, image_dim), jnp.float32),
        compiler_params=pltpu.CompilerParams(vmem_limit_bytes=vmem2),
        cost_estimate=pl.CostEstimate(
            flops=int(2 * B * feat_dim * image_dim),
            transcendentals=int(B),
            bytes_accessed=int(4 * B * feat_dim + 2 * feat_dim * image_dim
                               + 8 * image_dim + 4 * B * image_dim),
        ),
    )(pooled, params["w_proj"], params["b_proj"], params["gamma"])
    return out


# ----------------------------- params -----------------------------

def init_params(key, *, in_chans=3, patch=4, stem_dim=256, feat_dim=1280, image_dim=2048):
    k1 = in_chans * patch * patch
    ks = jax.random.split(key, 6)

    def w(k, shape):
        fan_in = shape[0]
        return (jax.random.normal(k, shape, jnp.float32) * (fan_in ** -0.5)).astype(jnp.bfloat16)

    return {
        # stand-in frozen feature extractor (TODO(synk): pretrained EfficientNet-B0 backbone)
        "w_stem": w(ks[0], (k1, stem_dim)),
        "b_stem": jax.random.normal(ks[1], (1, stem_dim), jnp.float32) * 0.02,
        "w_feat": w(ks[2], (stem_dim, feat_dim)),
        "b_feat": jax.random.normal(ks[3], (1, feat_dim), jnp.float32) * 0.02,
        # vision_proj: nn.Linear(1280, image_dim), weight stored transposed as (in, out)
        "w_proj": w(ks[4], (feat_dim, image_dim)),
        "b_proj": jax.random.normal(ks[5], (1, image_dim), jnp.float32) * 0.02,
        # image_norm: RMSNorm(image_dim) scale
        "gamma": jnp.ones((1, image_dim), jnp.float32),
    }


# ----------------------------- pure-JAX reference -----------------------------

def _ref_forward(images, params, patch):
    xp = _extract_patches(images, patch).astype(jnp.bfloat16)
    h = jnp.dot(xp, params["w_stem"], preferred_element_type=jnp.float32) + params["b_stem"]
    h = h.astype(jnp.bfloat16)
    h = h * jax.nn.sigmoid(h)
    f = jnp.dot(h, params["w_feat"], preferred_element_type=jnp.float32) + params["b_feat"]
    f = f.astype(jnp.bfloat16)
    f = f * jax.nn.sigmoid(f)
    pooled = jnp.mean(f.astype(jnp.float32), axis=1)                         # (B, 1280)
    proj = jnp.dot(pooled.astype(jnp.bfloat16), params["w_proj"],
                   preferred_element_type=jnp.float32) + params["b_proj"]
    ms = jnp.mean(proj * proj, axis=-1, keepdims=True)
    return proj * jax.lax.rsqrt(ms + EPS) * params["gamma"]


# ----------------------------- demo -----------------------------

if __name__ == "__main__":
    B, C, H, W = 2, 3, 32, 32
    PATCH = 4            # 8x8 = 64 patches per image
    STEM_DIM = 256
    FEAT_DIM = 1280      # EfficientNet-B0 feature width (hard-coded by nn.Linear(1280, image_dim))
    IMAGE_DIM = 256      # module default is 2048; small lane-dense value for the test

    key = jax.random.PRNGKey(0)
    kp, ki = jax.random.split(key)
    params = init_params(kp, in_chans=C, patch=PATCH, stem_dim=STEM_DIM,
                         feat_dim=FEAT_DIM, image_dim=IMAGE_DIM)
    images = jax.random.normal(ki, (B, C, H, W), jnp.float32)

    out = jax.block_until_ready(multimodal_encode(images, params, patch=PATCH))
    ref = jax.block_until_ready(_ref_forward(images, params, PATCH))

    assert out.shape == (B, IMAGE_DIM)
    assert jnp.allclose(out, ref, rtol=2e-2, atol=2e-2), "mismatch vs JAX reference"
    print("KERNEL_OK")
</pallas_src>

<mosaic_0001>
module attributes {stable_mosaic.version = 11 : i64} {
  func.func @_feature_pool_kernel(%arg0: i32, %arg1: memref<64x48xbf16, #tpu.memory_space<vmem>>, %arg2: memref<48x256xbf16, #tpu.memory_space<vmem>>, %arg3: memref<1x256xf32, #tpu.memory_space<vmem>>, %arg4: memref<256x1280xbf16, #tpu.memory_space<vmem>>, %arg5: memref<1x1280xf32, #tpu.memory_space<vmem>>, %arg6: memref<1x1x1280xf32, #tpu.memory_space<vmem>>) attributes {dimension_semantics = [#tpu.dimension_semantics<parallel>], iteration_bounds = array<i64: 2>, scalar_prefetch = 0 : i64, scratch_operands = 0 : i64, tpu.core_type = #tpu.core_type<tc>, window_params = [{transform_indices = @transform_0, window_bounds = array<i64: 64, 48>}, {pipeline_mode = #tpu.pipeline_mode<synchronous>, transform_indices = @transform_1, window_bounds = array<i64: 48, 256>}, {pipeline_mode = #tpu.pipeline_mode<synchronous>, transform_indices = @transform_2, window_bounds = array<i64: 1, 256>}, {pipeline_mode = #tpu.pipeline_mode<synchronous>, transform_indices = @transform_3, window_bounds = array<i64: 256, 1280>}, {pipeline_mode = #tpu.pipeline_mode<synchronous>, transform_indices = @transform_4, window_bounds = array<i64: 1, 1280>}, {transform_indices = @transform_5, window_bounds = array<i64: 1, 1, 1280>}]} {
    %c0 = arith.constant 0 : index
    %c0_0 = arith.constant 0 : index
    %0 = vector.load %arg1[%c0, %c0_0] : memref<64x48xbf16, #tpu.memory_space<vmem>>, vector<64x48xbf16>
    %c0_1 = arith.constant 0 : index
    %c0_2 = arith.constant 0 : index
    %1 = vector.load %arg2[%c0_1, %c0_2] : memref<48x256xbf16, #tpu.memory_space<vmem>>, vector<48x256xbf16>
    %cst = arith.constant dense<0.000000e+00> : vector<64x256xf32>
    %2 = tpu.matmul %0, %1, %cst {dimension_numbers = #tpu.dot_dimension_numbers<[1], [0], [0], [1], [0, 0, 1, 1], [], []>} : vector<64x48xbf16>, vector<48x256xbf16>, vector<64x256xf32> -> vector<64x256xf32>
    %c0_3 = arith.constant 0 : index
    %c0_4 = arith.constant 0 : index
    %3 = vector.load %arg3[%c0_3, %c0_4] : memref<1x256xf32, #tpu.memory_space<vmem>>, vector<1x256xf32>
    %4 = vector.broadcast %3 : vector<1x256xf32> to vector<64x256xf32>
    %5 = arith.addf %2, %4 : vector<64x256xf32>
    %6 = arith.truncf %5 : vector<64x256xf32> to vector<64x256xbf16>
    %7 = arith.negf %6 : vector<64x256xbf16>
    %8 = math.exp %7 : vector<64x256xbf16>
    %cst_5 = arith.constant 1.000000e+00 : bf16
    %9 = vector.broadcast %cst_5 : bf16 to vector<64x256xbf16>
    %10 = arith.addf %9, %8 : vector<64x256xbf16>
    %11 = arith.divf %9, %10 : vector<64x256xbf16>
    %12 = arith.mulf %6, %11 : vector<64x256xbf16>
    %c0_6 = arith.constant 0 : index
    %c0_7 = arith.constant 0 : index
    %13 = vector.load %arg4[%c0_6, %c0_7] : memref<256x1280xbf16, #tpu.memory_space<vmem>>, vector<256x1280xbf16>
    %cst_8 = arith.constant dense<0.000000e+00> : vector<64x1280xf32>
    %14 = tpu.matmul %12, %13, %cst_8 {dimension_numbers = #tpu.dot_dimension_numbers<[1], [0], [0], [1], [0, 0, 1, 1], [], []>} : vector<64x256xbf16>, vector<256x1280xbf16>, vector<64x1280xf32> -> vector<64x1280xf32>
    %c0_9 = arith.constant 0 : index
    %c0_10 = arith.constant 0 : index
    %15 = vector.load %arg5[%c0_9, %c0_10] : memref<1x1280xf32, #tpu.memory_space<vmem>>, vector<1x1280xf32>
    %16 = vector.broadcast %15 : vector<1x1280xf32> to vector<64x1280xf32>
    %17 = arith.addf %14, %16 : vector<64x1280xf32>
    %18 = arith.truncf %17 : vector<64x1280xf32> to vector<64x1280xbf16>
    %19 = arith.negf %18 : vector<64x1280xbf16>
    %20 = math.exp %19 : vector<64x1280xbf16>
    %cst_11 = arith.constant 1.000000e+00 : bf16
    %21 = vector.broadcast %cst_11 : bf16 to vector<64x1280xbf16>
    %22 = arith.addf %21, %20 : vector<64x1280xbf16>
    %23 = arith.divf %21, %22 : vector<64x1280xbf16>
    %24 = arith.mulf %18, %23 : vector<64x1280xbf16>
    %25 = arith.extf %24 : vector<64x1280xbf16> to vector<64x1280xf32>
    %cst_12 = arith.constant dense<0.000000e+00> : vector<1280xf32>
    %26 = vector.multi_reduction <add>, %25, %cst_12 [0] : vector<64x1280xf32> to vector<1280xf32>
    %27 = vector.shape_cast %26 : vector<1280xf32> to vector<1x1280xf32>
    %cst_13 = arith.constant 1.562500e-02 : f32
    %28 = vector.broadcast %cst_13 : f32 to vector<1x1280xf32>
    %29 = arith.mulf %27, %28 : vector<1x1280xf32>
    %c0_14 = arith.constant 0 : index
    %c0_15 = arith.constant 0 : index
    %c0_16 = arith.constant 0 : index
    %30 = vector.load %arg6[%c0_14, %c0_15, %c0_16] : memref<1x1x1280xf32, #tpu.memory_space<vmem>>, vector<1x1x1280xf32>
    %31 = vector.shape_cast %30 : vector<1x1x1280xf32> to vector<1x1280xf32>
    %32 = vector.shape_cast %29 : vector<1x1280xf32> to vector<1x1x1280xf32>
    tpu.vector_store %arg6[%c0_14, %c0_15, %c0_16], %32 {strides = array<i32>} : memref<1x1x1280xf32, #tpu.memory_space<vmem>>, vector<1x1x1280xf32>,
    return
  }
  func.func @transform_0(%arg0: i32) -> (i32, i32) {
    %c0_i32 = arith.constant 0 : i32
    %c0_i32_0 = arith.constant 0 : i32
    return %arg0, %c0_i32 : i32, i32
  }
  func.func @transform_1(%arg0: i32) -> (i32, i32) {
    %c0_i32 = arith.constant 0 : i32
    %c0_i32_0 = arith.constant 0 : i32
    %c0_i32_1 = arith.constant 0 : i32
    return %c0_i32, %c0_i32_0 : i32, i32
  }
  func.func @transform_2(%arg0: i32) -> (i32, i32) {
    %c0_i32 = arith.constant 0 : i32
    %c0_i32_0 = arith.constant 0 : i32
    %c0_i32_1 = arith.constant 0 : i32
    return %c0_i32, %c0_i32_0 : i32, i32
  }
  func.func @transform_3(%arg0: i32) -> (i32, i32) {
    %c0_i32 = arith.constant 0 : i32
    %c0_i32_0 = arith.constant 0 : i32
    %c0_i32_1 = arith.constant 0 : i32
    return %c0_i32, %c0_i32_0 : i32, i32
  }
  func.func @transform_4(%arg0: i32) -> (i32, i32) {
    %c0_i32 = arith.constant 0 : i32
    %c0_i32_0 = arith.constant 0 : i32
    %c0_i32_1 = arith.constant 0 : i32
    return %c0_i32, %c0_i32_0 : i32, i32
  }
  func.func @transform_5(%arg0: i32) -> (i32, i32, i32) {
    %c0_i32 = arith.constant 0 : i32
    %c0_i32_0 = arith.constant 0 : i32
    %c0_i32_1 = arith.constant 0 : i32
    return %arg0, %c0_i32, %c0_i32_0 : i32, i32, i32
  }
}

</mosaic_0001>

<bundles_post_ra>
// kernel: tpu_custom_call.1
= control target key start
LH: loop header
LB: loop body
LE: loop exit
PB: predicated region body
PF: predicated region fallthrough
CT: control target
= control target key end

     0   :  { %10 = vsyncpa [#allocation3], 0  ;;  %s4096_s0 = inlined_call_operand.vmem [shape: bf16[128,48], index: 0, kind: input, shape index: {}]   ;;  %s4097_s1 = inlined_call_operand.vmem [shape: bf16[48,256], index: 1, kind: input, shape index: {}]   ;;  %s4098_s2 = inlined_call_operand.vmem [shape: f32[1,256], index: 2, kind: input, shape index: {}]   ;;  %s4099_s3 = inlined_call_operand.hbm [shape: bf16[256,1280], index: 3, kind: input, shape index: {}]   ;;  %s4100_s4 = inlined_call_operand.vmem [shape: f32[1,1280], index: 4, kind: input, shape index: {}]   ;;  %s4101_s5 = inlined_call_operand.hbm [shape: f32[2,1,1280], index: 5, kind: output, shape index: {}]  }
   0x1   :  { %11 = vsyncpa [#allocation4], 0 }
   0x2   :  { %13 = vsyncpa [#allocation4 + $0x1], 0  ;;  %s3501_s18 = smov 0   ;;  %s3503_s19 = smov 0  }
   0x3   :  { %s3505_s20 = smov 0   ;;  %s3507_s21 = smov 0  }
   0x4 LB: > { %s3522_s22 = sadd.s32 4294967295, %s3463_s21   ;;  %s2603_s23 = sadd.s32 4294967294, %s3463_s21   ;;  %s3463_s21 = sphi %s3507_s21, %s4117_s21   ;;  %s3459_s20 = sphi %s3505_s20, %s4116_s20   ;;  %s3455_s19 = sphi %s3503_s19, %s4115_s19   ;;  %s3451_s18 = sphi %s3501_s18, %s4114_s18  }
   0x5   : > { %s3526_s24 = sadd.s32 1, %s3463_s21   ;;  %s136_s25 = sadd.s32 1, %s3459_s20 }
   0x6   : > { %s133_s26 = ssub.s32 %s3463_s21, %s3526_s24  ;;  %p146_p0 = scmp.ne.s32.totalorder %s3459_s20, %s3455_s19 }
   0x7   : > { %p134_p1 = scmp.eq.s32.totalorder %s133_s26, 0  ;;  %p147_p2 = scmp.eq.s32.totalorder %s3522_s22, 1 }
   0x8   : > { %p152_p3 = scmp.ne.s32.totalorder %s3455_s19, %s3451_s18  ;;  %p153_p4 = scmp.eq.s32.totalorder %s2603_s23, 1 }
   0x9   : > { %s3537_s27 = scalar_select %p134_p1, %s3459_s20, %s136_s25  }
   0xa   : > { %p3539_p5 = por %p147_p2, %p146_p0  ;;  %p3543_p6 = por %p153_p4, %p152_p3 }
   0xb   : > { %p2604_p7 = scmp.ge.s32.totalorder %s3463_s21, 1  ;;  %p160_p8 = scmp.lt.s32.totalorder %s3463_s21, 3 }
   0xc   : > { %s4105_s28 = scalar_select %p3539_p5, 1, 0 }
   0xd   : > { %s4106_s29 = scalar_select %p3543_p6, 1, 0 }
   0xe   : > { %p4102_p9 = scmp.eq.s32.totalorder %s3522_s22, 0  ;;  %p3550_p10 = pnand %p2604_p7, %p160_p8 }
   0xf   : > { %s3465_s6 = smov [#allocation2]   ;;  %s3369_s11 = scalar_lea.hbm %s4099_s3, 20480 }
  0x10   : > { %s4107_s30 = scalar_select %p3550_p10, 1, 0 }
  0x11   : > { %s178_s7 = sshll.u32 %s3465_s6, 4  ;;  %p2876_p11 = pneg %p3550_p10  ;;  %s179_s7 = int_to_ptr.vmem [resolvable:$true] %s178_s7 }
  0x12   : > { %p3370_p13 = scmp.ne.s32.totalorder %s4099_s3, %s3369_s11  ;;  %p3376_p3 = scmp.lt.u32.totalorder %s3369_s11, %s4099_s3 }
  0x13   : > { %p3558_p12 = pnand %p4102_p9, %p2876_p11 }
  0x15   : > { %p3371_p0 = pneg %p3558_p12 }
  0x17   : > { %p3372_p1 = pnand %p3371_p0, %p3370_p13 }
  0x19   : > { %p3373_p2 = pneg %p3372_p1 }
  0x1b   : > { %p3378_p4 = pnand %p3376_p3, %p3373_p2 }
  0x1d   : > { %3381 = shalt.err (!%p3378_p4)
}
  0x1e   : > { %s3382_s16 = scalar_lea.vmem %s179_s7, 20480  ;;  %p3390_p9 = scmp.lt.s32.totalorder %s179_s7, %s179_s7 }
  0x1f   : > { %p3383_p7 = scmp.ne.s32.totalorder %s179_s7, %s3382_s16  ;;  %p3391_p6 = scmp.lt.s32.totalorder %s3382_s16, %s3382_s16 }
  0x21   : > { %p3385_p8 = pnand %p3383_p7, %p3371_p0  ;;  %p3392_p5 = por %p3391_p6, %p3390_p9 }
  0x23   : > { %p3386_p11 = pneg %p3385_p8 }
  0x25   : > { %p3393_p10 = pnand %p3392_p5, %p3386_p11 }
  0x27   : > { %3396 = shalt.err (!%p3393_p10)
}
  0x28   : > { %s3466_s17 = smov 640   ;;  %s3467_s23 = smov 40  }
  0x29   : > { %2879 = dma.hbm_to_vmem [thread:$0]  (!%p3558_p12), %s4099_s3, 20480, %s179_s7, [#allocation3], %s3466_s17, %s3466_s17, %s3467_s23  }
  0x2a   : > { %p4109_p13 = scmp.ne.s32.totalorder %s4107_s30, 0 }
  0x2b   : > { %p4110_p1 = scmp.eq.s32.totalorder (!%p4109_p13), %s3522_s22, 0 }
  0x2c   : > { %206 = sbr.rel (%p4109_p13) target bundleno = 754 (0x2f2), region = 40 }
  0x33   : > { %3442 = dma.done.wait (%p4110_p1), [#allocation3], 20480   ;;  %p4111_p0 = pmov %p4110_p1 }
  0x34   : > { %s2609_s6 = sshll.u32 %s3522_s22, 3  ;;  %v3468_v0 = vmov 0   ;;  %v2924_v1 = vld [vmem:[%s4097_s1 + $0x4] ss:$8 sps:$4 sm:$0xff]   ;;  %v2926_v2 = vld [vmem:[%s4097_s1] ss:$8 sps:$4 sm:$0xff]  }
  0x35   : > { %3444 = vsyncadd (%p4111_p0), [#allocation3], 4294946816  ;;  %363 = vmatprep.mubr.bf16.mxu0 %v3468_v0  ;;  %p235_p5 = scmp.lt.s32.totalorder %s2609_s6, 15  ;;  %331 = vmatprep.subr.bf16.mxu0 %v2924_v1  ;;  %v2927_v3 = vld [vmem:[%s4097_s1 + $0x14] ss:$8 sps:$4 sm:$0xff]   ;;  %vm318_vm0 = vcmask 392192  }
  0x36   : > { %332 = vmatpush1.bf16.msra.mxu0 %v2926_v2  ;;  %v2929_v4 = vld [vmem:[%s4097_s1 + $0x10] ss:$8 sps:$4 sm:$0xff]   ;;  %v2930_v5 = vld [vmem:[%s4097_s1 + $0x24] ss:$8 sps:$4 sm:$0xff]   ;;  %v2932_v6 = vld [vmem:[%s4097_s1 + $0x20] ss:$8 sps:$4 sm:$0xff]  }
  0x37   : > { %s4119_s6 = smov (!%p235_p5, %s2609_s6), 15  ;;  %333 = vmatprep.subr.bf16.mxu0 %v2927_v3  ;;  %v2937_v8 = vld [vmem:[#allocation2 + $0x4] ss:$40 sps:$4 sm:$0xff]   ;;  %v2939_v9 = vld [vmem:[#allocation2 + $0x8] ss:$40 sps:$4 sm:$0xff]   ;;  %s231_s12 = sand.u32 1, %s3455_s19  }
  0x38   : > { %s2610_s7 = sshll.u32 %s4119_s6, 2  ;;  %1490 = vmatprep.subr.bf16.mxu1 %v2937_v8  ;;  %v2941_v10 = vld [vmem:[#allocation2 + $0xc] ss:$40 sps:$4 sm:$0xff]   ;;  %v2942_v11 = vld [vmem:[#allocation2] ss:$40 sps:$4 sm:$0xff]   ;;  %s2868_s13 = smul.u32 10, %s231_s12 }
  0x39   : > { %s3601_s17 = scalar_lea.vmem %s4096_s0, %s2610_s7  ;;  %v2943_v12 = vld [vmem:[#allocation2 + $0x54] ss:$40 sps:$4 sm:$0xff]   ;;  %1491 = vmatpush1.bf16.msra.mxu1 %v2942_v11  ;;  %v2948_v14 = vld [vmem:[#allocation2 + $0x50] ss:$40 sps:$4 sm:$0xff]   ;;  %v2949_v15 = vld [vmem:[#allocation2 + $0xa4] ss:$40 sps:$4 sm:$0xff]  }
  0x3a   : > { %334 = vmatpush1.bf16.msra.mxu0 %v2929_v4  ;;  %v2933_v7 = vld [vmem:[%s3601_s17] sm:$0xff]   ;;  %v2947_v13 = vld [vmem:[#allocation2 + $0x5c] ss:$40 sps:$4 sm:$0xff]   ;;  %1492 = vmatprep.subr.bf16.mxu1 %v2943_v12  ;;  %v2945_v16 = vld [vmem:[#allocation2 + $0x58] ss:$40 sps:$4 sm:$0xff]   ;;  %s4036_s14 = scalar_lea.vmem [#allocation5], %s2868_s13 }
  0x3b   : > { %335 = vmatprep.subr.bf16.mxu0 %v2930_v5  ;;  %v2953_v17 = vld [vmem:[#allocation2 + $0xac] ss:$40 sps:$4 sm:$0xff]   ;;  %v2954_v18 = vld [vmem:[#allocation2 + $0xa0] ss:$40 sps:$4 sm:$0xff]   ;;  %v2934_v20 = vld [vmem:[%s3601_s17 + $0x8] sm:$0xff]   ;;  %s2869_s15 = smul.u32 160, %s3522_s22 }
  0x3c   : > { %v2955_v19 = vld [vmem:[#allocation2 + $0xf4] ss:$40 sps:$4 sm:$0xff]   ;;  %v2951_v21 = vld [vmem:[#allocation2 + $0xa8] ss:$40 sps:$4 sm:$0xff]   ;;  %v2961_v24 = vld [vmem:[#allocation2 + $0x144] ss:$40 sps:$4 sm:$0xff]  }
  0x3d   : > { %1493 = vmatpush1.bf16.msra.mxu1 %v2948_v14  ;;  %v2959_v22 = vld [vmem:[#allocation2 + $0xfc] ss:$40 sps:$4 sm:$0xff]   ;;  %v2960_v23 = vld [vmem:[#allocation2 + $0xf0] ss:$40 sps:$4 sm:$0xff]   ;;  %v2965_v26 = vld [vmem:[#allocation2 + $0x14c] ss:$40 sps:$4 sm:$0xff]   ;;  %s4051_s25 = scalar_lea.hbm %s4101_s5, %s2869_s15 }
  0x3e   : > { %336 = vmatpush1.bf16.msra.mxu0 %v2932_v6  ;;  %1494 = vmatprep.subr.bf16.mxu1 %v2949_v15  ;;  %v2957_v25 = vld [vmem:[#allocation2 + $0xf8] ss:$40 sps:$4 sm:$0xff]   ;;  %v2967_v29 = vld [vmem:[#allocation2 + $0x194] ss:$40 sps:$4 sm:$0xff]   ;;  %v2963_v30 = vld [vmem:[#allocation2 + $0x148] ss:$40 sps:$4 sm:$0xff]  }
  0x3f   : > { %1563 = vmatprep.subr.bf16.mxu0 %v2941_v10  ;;  %v2966_v27 = vld [vmem:[#allocation2 + $0x140] ss:$40 sps:$4 sm:$0xff]   ;;  %v2971_v31 = vld [vmem:[#allocation2 + $0x19c] ss:$40 sps:$4 sm:$0xff]   ;;  %v2972_v32 = vld [vmem:[#allocation2 + $0x190] ss:$40 sps:$4 sm:$0xff]  }
  0x40   : > { %v2935_v28 = vld [vmem:[%s3601_s17 + $0x10] sm:$0xff]   ;;  %v2936_v34 = vld [vmem:[%s3601_s17 + $0x18] sm:$0xff]   ;;  %v2979_v39 = vld [vmem:[#allocation2 + $0x234] ss:$40 sps:$4 sm:$0xff]   ;;  %s2532_s16 = sshll.u32 %s4036_s14, 4  ;;  %s2518_s22 = scalar_lea.sflag [#allocation4], %s231_s12  ;;  %s4053_s16 = int_to_ptr.vmem [resolvable:$true] %s2532_s16 }
  0x41   : > { %2621 = vmatmul.mubr.msk.bf16.vlgmr.msra.gmra.mrb[0].mxu0 %vm318_vm0, %v2933_v7  ;;  %1495 = vmatpush1.bf16.msra.mxu1 %v2954_v18  ;;  %v2969_v33 = vld [vmem:[#allocation2 + $0x198] ss:$40 sps:$4 sm:$0xff]   ;;  %v2973_v35 = vld [vmem:[#allocation2 + $0x1e4] ss:$40 sps:$4 sm:$0xff]   ;;  %v2975_v37 = vld [vmem:[#allocation2 + $0x1e8] ss:$40 sps:$4 sm:$0xff]  }
  0x42   : > { %373 = vmatprep.mubr.bf16.mxu0 %v3468_v0  ;;  %1564 = vmatpush1.bf16.msra.mxu0 %v2939_v9  ;;  %v2977_v36 = vld [vmem:[#allocation2 + $0x1ec] ss:$40 sps:$4 sm:$0xff]   ;;  %v2978_v38 = vld [vmem:[#allocation2 + $0x1e0] ss:$40 sps:$4 sm:$0xff]   ;;  %v2983_v40 = vld [vmem:[#allocation2 + $0x23c] ss:$40 sps:$4 sm:$0xff]  }
  0x43   : > { %1565 = vmatprep.subr.bf16.mxu0 %v2947_v13  ;;  %1496 = vmatprep.subr.bf16.mxu1 %v2955_v19  ;;  %v2981_v41 = vld [vmem:[#allocation2 + $0x238] ss:$40 sps:$4 sm:$0xff]   ;;  %v2985_v43 = vld [vmem:[#allocation2 + $0x284] ss:$40 sps:$4 sm:$0xff]   ;;  %v2987_v45 = vld [vmem:[#allocation2 + $0x288] ss:$40 sps:$4 sm:$0xff]   ;;  %v258_v13 = vlaneseq }
  0x44   : > { %v2984_v42 = vld [vmem:[#allocation2 + $0x230] ss:$40 sps:$4 sm:$0xff]   ;;  %v2989_v44 = vld [vmem:[#allocation2 + $0x28c] ss:$40 sps:$4 sm:$0xff]   ;;  %v2990_v46 = vld [vmem:[#allocation2 + $0x280] ss:$40 sps:$4 sm:$0xff]  }
  0x45   : > { %1497 = vmatpush1.bf16.msra.mxu1 %v2960_v23  ;;  %v2991_v47 = vld [vmem:[#allocation2 + $0x2d4] ss:$40 sps:$4 sm:$0xff]   ;;  %v2993_v49 = vld [vmem:[#allocation2 + $0x2d8] ss:$40 sps:$4 sm:$0xff]   ;;  %v2997_v51 = vld [vmem:[#allocation2 + $0x324] ss:$40 sps:$4 sm:$0xff]  }
  0x46   : > { %1566 = vmatpush1.bf16.msra.mxu0 %v2945_v16  ;;  %1498 = vmatprep.subr.bf16.mxu1 %v2961_v24  ;;  %v2995_v48 = vld [vmem:[#allocation2 + $0x2dc] ss:$40 sps:$4 sm:$0xff]   ;;  %v2996_v50 = vld [vmem:[#allocation2 + $0x2d0] ss:$40 sps:$4 sm:$0xff]   ;;  %v3001_v52 = vld [vmem:[#allocation2 + $0x32c] ss:$40 sps:$4 sm:$0xff]  }
  0x47   : > { %1567 = vmatprep.subr.bf16.mxu0 %v2953_v17  ;;  %v2999_v53 = vld [vmem:[#allocation2 + $0x328] ss:$40 sps:$4 sm:$0xff]   ;;  %v3003_v55 = vld [vmem:[#allocation2 + $0x374] ss:$40 sps:$4 sm:$0xff]   ;;  %v3005_v57 = vld [vmem:[#allocation2 + $0x378] ss:$40 sps:$4 sm:$0xff]  }
  0x48   : > { %v3002_v54 = vld [vmem:[#allocation2 + $0x320] ss:$40 sps:$4 sm:$0xff]   ;;  %v3007_v56 = vld [vmem:[#allocation2 + $0x37c] ss:$40 sps:$4 sm:$0xff]   ;;  %v3008_v58 = vld [vmem:[#allocation2 + $0x370] ss:$40 sps:$4 sm:$0xff]  }
  0x49   : > { %2622 = vmatmul.mubr.msk.bf16.gmra.mrb[4].mxu0 %vm318_vm0, %v2934_v20  ;;  %1499 = vmatpush1.bf16.msra.mxu1 %v2966_v27  ;;  %v3009_v59 = vld [vmem:[#allocation2 + $0x3c4] ss:$40 sps:$4 sm:$0xff]   ;;  %v3011_v61 = vld [vmem:[#allocation2 + $0x3c8] ss:$40 sps:$4 sm:$0xff]   ;;  %v3015_v63 = vld [vmem:[#allocation2 + $0x414] ss:$40 sps:$4 sm:$0xff]  }
  0x4a   : > { %383 = vmatprep.mubr.bf16.mxu0 %v3468_v0  ;;  %1568 = vmatpush1.bf16.msra.mxu0 %v2951_v21  ;;  %v3013_v60 = vld [vmem:[#allocation2 + $0x3cc] ss:$40 sps:$4 sm:$0xff]   ;;  %v3014_v62 = vld [vmem:[#allocation2 + $0x3c0] ss:$40 sps:$4 sm:$0xff]   ;;  %v3020_v2 = vld [vmem:[#allocation2 + $0x410] ss:$40 sps:$4 sm:$0xff]  }
  0x4b   : > { %1569 = vmatprep.subr.bf16.mxu0 %v2959_v22  ;;  %1500 = vmatprep.subr.bf16.mxu1 %v2967_v29  ;;  %v3017_v1 = vld [vmem:[#allocation2 + $0x418] ss:$40 sps:$4 sm:$0xff]   ;;  %v3021_v3 = vld [vmem:[#allocation2 + $0x464] ss:$40 sps:$4 sm:$0xff]   ;;  %v3023_v5 = vld [vmem:[#allocation2 + $0x468] ss:$40 sps:$4 sm:$0xff]  }
  0x4c   : > { %v3025_v4 = vld [vmem:[#allocation2 + $0x46c] ss:$40 sps:$4 sm:$0xff]   ;;  %v3026_v6 = vld [vmem:[#allocation2 + $0x460] ss:$40 sps:$4 sm:$0xff]   ;;  %v3031_v8 = vld [vmem:[#allocation2 + $0x4bc] ss:$40 sps:$4 sm:$0xff]  }
  0x4d   : > { %1501 = vmatpush1.bf16.msra.mxu1 %v2972_v32  ;;  %v3027_v7 = vld [vmem:[#allocation2 + $0x4b4] ss:$40 sps:$4 sm:$0xff]   ;;  %v3029_v9 = vld [vmem:[#allocation2 + $0x4b8] ss:$40 sps:$4 sm:$0xff]   ;;  %v3621_v14 = vshrl.u32 %v258_v13, 7  ;;  %vm2514_vm1 = vcmp.lt.s32.totalorder %v258_v13, 256 }
  0x4e   : > { %1570 = vmatpush1.bf16.msra.mxu0 %v2957_v25  ;;  %1502 = vmatprep.subr.bf16.mxu1 %v2973_v35  ;;  %v3032_v10 = vld [vmem:[#allocation2 + $0x4b0] ss:$40 sps:$4 sm:$0xff]   ;;  %v3035_v11 = vld [vmem:[#allocation2 + $0x14] ss:$40 sps:$4 sm:$0xff]   ;;  %s3397_s26 = scalar_lea.vmem %s4053_s16, 160  ;;  %p4112_p9 = scmp.ne.s32.totalorder %s4105_s28, 0 }
  0x4f   : > { %1571 = vmatprep.subr.bf16.mxu0 %v2965_v26  ;;  %v3038_v12 = vld [vmem:[#allocation2 + $0x1c] ss:$40 sps:$4 sm:$0xff]   ;;  %v3624_v15 = vsub.s32 0, %v3621_v14  ;;  %v256_v16 = vld [vmem:[%s4098_s2] sm:$0x3]  ;;  %v3630_v17 = vsub.s32 1, %v3621_v14  ;;  %p3398_p6 = scmp.ne.s32.totalorder %s4053_s16, %s3397_s26 }
  0x50   : > { %s3470_s6 = smov [#allocation5]  }
  0x51   : > { %2623 = vmatmul.mubr.msk.bf16.gmra.mrb[8].mxu0 %vm318_vm0, %v2935_v28  ;;  %1503 = vmatpush1.bf16.msra.mxu1 %v2978_v38  ;;  %v261_v18 = vrot.slane %v256_v16, %v3624_v15  ;;  %v265_v20 = vrot.slane %v256_v16, %v3630_v17  ;;  %p3399_p10 = pnand %p3398_p6, %p4112_p9  ;;  %s3401_s8 = sshll.u32 %s3470_s6, 4  ;;  %s3402_s8 = int_to_ptr.vmem [resolvable:$false] %s3401_s8 }
  0x52   : > { %393 = vmatprep.mubr.bf16.mxu0 %v3468_v0  ;;  %1572 = vmatpush1.bf16.msra.mxu0 %v2963_v30  ;;  %v3019_v0 = vld [vmem:[#allocation2 + $0x41c] ss:$40 sps:$4 sm:$0xff]   ;;  %s3403_s9 = scalar_lea.vmem %s3402_s8, 320  ;;  %p3404_p2 = scmp.lt.s32.totalorder %s4053_s16, %s3402_s8 }
  0x53   : > { %1573 = vmatprep.subr.bf16.mxu0 %v2971_v31  ;;  %1504 = vmatprep.subr.bf16.mxu1 %v2979_v39  ;;  %p3400_p12 = pneg %p3399_p10  ;;  %p3405_p3 = scmp.lt.s32.totalorder %s3403_s9, %s3397_s26 }
  0x55   : > { %1505 = vmatpush1.bf16.msra.mxu1 %v2984_v42  ;;  %p3406_p4 = por %p3405_p3, %p3404_p2 }
  0x56   : > { %1574 = vmatpush1.bf16.msra.mxu0 %v2969_v33  ;;  %1506 = vmatprep.subr.bf16.mxu1 %v2985_v43 }
  0x57   : > { %1575 = vmatprep.subr.bf16.mxu0 %v2977_v36  ;;  %p3407_p7 = pnand %p3406_p4, %p3400_p12 }
  0x59   : > { %2624 = vmatmul.mubr.msk.bf16.gmra.mrb[12].mxu0 %vm318_vm0, %v2936_v34  ;;  %1507 = vmatpush1.bf16.msra.mxu1 %v2990_v46 }
  0x5a   : > { %1576 = vmatpush1.bf16.msra.mxu0 %v2975_v37  ;;  %1508 = vmatprep.subr.bf16.mxu1 %v2991_v47 }
  0x5b   : > { %1577 = vmatprep.subr.bf16.mxu0 %v2983_v40 }
  0x5d   : > { %1509 = vmatpush1.bf16.msra.mxu1 %v2996_v50 }
  0x5e   : > { %1578 = vmatpush1.bf16.msra.mxu0 %v2981_v41  ;;  %1510 = vmatprep.subr.bf16.mxu1 %v2997_v51 }
  0x5f   : > { %1579 = vmatprep.subr.bf16.mxu0 %v2989_v44 }
  0x61   : > { %1511 = vmatpush1.bf16.msra.mxu1 %v3002_v54 }
  0x62   : > { %1580 = vmatpush1.bf16.msra.mxu0 %v2987_v45  ;;  %1512 = vmatprep.subr.bf16.mxu1 %v3003_v55 }
  0x63   : > { %1581 = vmatprep.subr.bf16.mxu0 %v2995_v48 }
  0x65   : > { %1513 = vmatpush1.bf16.msra.mxu1 %v3008_v58 }
  0x66   : > { %1582 = vmatpush1.bf16.msra.mxu0 %v2993_v49  ;;  %1514 = vmatprep.subr.bf16.mxu1 %v3009_v59 }
  0x67   : > { %1583 = vmatprep.subr.bf16.mxu0 %v3001_v52 }
  0x69   : > { %1515 = vmatpush1.bf16.msra.mxu1 %v3014_v62 }
  0x6a   : > { %1584 = vmatpush1.bf16.msra.mxu0 %v2999_v53  ;;  %1516 = vmatprep.subr.bf16.mxu1 %v3015_v63 }
  0x6b   : > { %1585 = vmatprep.subr.bf16.mxu0 %v3007_v56 }
  0x6d   : > { %1517 = vmatpush1.bf16.msra.mxu1 %v3020_v2 }
  0x6e   : > { %1586 = vmatpush1.bf16.msra.mxu0 %v3005_v57  ;;  %1518 = vmatprep.subr.bf16.mxu1 %v3021_v3 }
  0x6f   : > { %1587 = vmatprep.subr.bf16.mxu0 %v3013_v60 }
  0x71   : > { %1519 = vmatpush1.bf16.msra.mxu1 %v3026_v6 }
  0x72   : > { %1588 = vmatpush1.bf16.msra.mxu0 %v3011_v61  ;;  %1520 = vmatprep.subr.bf16.mxu1 %v3027_v7 }
  0x73   : > { %1589 = vmatprep.subr.bf16.mxu0 %v3019_v0 }
  0x75   : > { %1521 = vmatpush1.bf16.msra.mxu1 %v3032_v10 }
  0x76   : > { %1590 = vmatpush1.bf16.msra.mxu0 %v3017_v1  ;;  %1636 = vmatprep.subr.bf16.mxu1 %v3035_v11 }
  0x77   : > { %1591 = vmatprep.subr.bf16.mxu0 %v3025_v4 }
  0x7a   : > { %1592 = vmatpush1.bf16.msra.mxu0 %v3023_v5 }
  0x7b   : > { %1593 = vmatprep.subr.bf16.mxu0 %v3031_v8 }
  0x7e   : > { %1594 = vmatpush1.bf16.msra.mxu0 %v3029_v9 }
  0x7f   : > { %1709 = vmatprep.subr.bf16.mxu0 %v3038_v12 }
 0x114   : > { %v365_v19 = vpop.f32.mrb[0].mxu0 }
 0x115   : > { %v367_v21 = vpop.f32.mrb[1].mxu0  ;;  %v366_v23 = vadd.f32 %v365_v19, %v261_v18 }
 0x116   : > { %v369_v22 = vpop.f32.mrb[2].mxu0  ;;  %v368_v26 = vadd.f32 %v367_v21, %v265_v20 }
 0x117   : > { %v370_v24 = vadd.f32 %v369_v22, %v261_v18  ;;  %v371_v25 = vpop.f32.mrb[3].mxu0 }
 0x118   : > { %v372_v27 = vadd.f32 %v371_v25, %v265_v20  ;;  %v3033_v25 = vld [vmem:[#allocation2 + $0x10] ss:$40 sps:$4 sm:$0xff]  }
 0x119   : > { %v3634_v28 = vpack.c.bf16 %v370_v24, %v366_v23 }
 0x11a   : > { %v3636_v29 = vpack.c.bf16 %v372_v27, %v368_v26  ;;  %v3036_v26 = vld [vmem:[#allocation2 + $0x18] ss:$40 sps:$4 sm:$0xff]  }
 0x11b   : > { %v2625_v30 = vmul.bf16 3216621497, %v3634_v28 }
 0x11c   : > { %v2626_v31 = vmul.bf16 3216621497, %v3636_v29  ;;  %v375_v32 = vpop.f32.mrb[4].mxu0 }
 0x11d   : > { %3177 = vpow.bf16 %v2625_v30  ;;  %v376_v33 = vadd.f32 %v375_v32, %v261_v18  ;;  %v377_v34 = vpop.f32.mrb[5].mxu0  ;;  %v3041_v30 = vld [vmem:[#allocation2 + $0x64] ss:$40 sps:$4 sm:$0xff]   ;;  %v3039_v32 = vld [vmem:[#allocation2 + $0x60] ss:$40 sps:$4 sm:$0xff]  }
 0x11e   : > { %3179 = vpow.bf16 %v2626_v31  ;;  %v378_v35 = vadd.f32 %v377_v34, %v265_v20  ;;  %v379_v36 = vpop.f32.mrb[6].mxu0  ;;  %v3044_v31 = vld [vmem:[#allocation2 + $0x6c] ss:$40 sps:$4 sm:$0xff]  }
 0x11f   : > { %v380_v37 = vadd.f32 %v379_v36, %v261_v18  ;;  %v381_v38 = vpop.f32.mrb[7].mxu0  ;;  %v3050_v36 = vld [vmem:[#allocation2 + $0xbc] ss:$40 sps:$4 sm:$0xff]  }
 0x120   : > { %v382_v39 = vadd.f32 %v381_v38, %v265_v20 }
 0x121   : > { %v3640_v40 = vpack.c.bf16 %v380_v37, %v376_v33  ;;  %v3042_v33 = vld [vmem:[#allocation2 + $0x68] ss:$40 sps:$4 sm:$0xff]  }
 0x122   : > { %v3642_v41 = vpack.c.bf16 %v382_v39, %v378_v35  ;;  %v3047_v35 = vld [vmem:[#allocation2 + $0xb4] ss:$40 sps:$4 sm:$0xff]  }
 0x123   : > { %v2627_v42 = vmul.bf16 3216621497, %v3640_v40 }
 0x124   : > { %v2628_v43 = vmul.bf16 3216621497, %v3642_v41  ;;  %v385_v44 = vpop.f32.mrb[8].mxu0 }
 0x125   : > { %3181 = vpow.bf16 %v2627_v42  ;;  %v386_v45 = vadd.f32 %v385_v44, %v261_v18  ;;  %v387_v46 = vpop.f32.mrb[9].mxu0 }
 0x126   : > { %3183 = vpow.bf16 %v2628_v43  ;;  %v388_v47 = vadd.f32 %v387_v46, %v265_v20  ;;  %v389_v48 = vpop.f32.mrb[10].mxu0  ;;  %v3048_v46 = vld [vmem:[#allocation2 + $0xb8] ss:$40 sps:$4 sm:$0xff]  }
 0x127   : > { %v390_v49 = vadd.f32 %v389_v48, %v261_v18  ;;  %v391_v50 = vpop.f32.mrb[11].mxu0  ;;  %v3053_v48 = vld [vmem:[#allocation2 + $0x104] ss:$40 sps:$4 sm:$0xff]  }
 0x128   : > { %v3178_v51 = vpop.eup %3177  ;;  %v392_v52 = vadd.f32 %v391_v50, %v265_v20  ;;  %v3051_v50 = vld [vmem:[#allocation2 + $0x100] ss:$40 sps:$4 sm:$0xff]  }
 0x129   : > { %v3180_v53 = vpop.eup %3179  ;;  %v444_v54 = vadd.bf16 1065369472, %v3178_v51  ;;  %v3646_v55 = vpack.c.bf16 %v390_v49, %v386_v45  ;;  %v3045_v45 = vld [vmem:[#allocation2 + $0xb0] ss:$40 sps:$4 sm:$0xff]   ;;  %v3056_v49 = vld [vmem:[#allocation2 + $0x10c] ss:$40 sps:$4 sm:$0xff]  }
 0x12a   : > { %v445_v56 = vadd.bf16 1065369472, %v3180_v53  ;;  %v3648_v57 = vpack.c.bf16 %v392_v52, %v388_v47  ;;  %v3059_v53 = vld [vmem:[#allocation2 + $0x154] ss:$40 sps:$4 sm:$0xff]  }
 0x12b   : > { %3185 = vrcp.bf16 %v444_v54  ;;  %v2629_v58 = vmul.bf16 3216621497, %v3646_v55  ;;  %v3062_v54 = vld [vmem:[#allocation2 + $0x15c] ss:$40 sps:$4 sm:$0xff]  }
 0x12c   : > { %3187 = vrcp.bf16 %v445_v56  ;;  %v2630_v59 = vmul.bf16 3216621497, %v3648_v57  ;;  %v395_v60 = vpop.f32.mrb[12].mxu0 }
 0x12d   : > { %3189 = vpow.bf16 %v2629_v58  ;;  %v396_v61 = vadd.f32 %v395_v60, %v261_v18  ;;  %v397_v62 = vpop.f32.mrb[13].mxu0  ;;  %v3060_v60 = vld [vmem:[#allocation2 + $0x158] ss:$40 sps:$4 sm:$0xff]  }
 0x12e   : > { %3191 = vpow.bf16 %v2630_v59  ;;  %v398_v63 = vadd.f32 %v397_v62, %v265_v20  ;;  %v399_v0 = vpop.f32.mrb[14].mxu0  ;;  %v3057_v59 = vld [vmem:[#allocation2 + $0x150] ss:$40 sps:$4 sm:$0xff]   ;;  %v3065_v62 = vld [vmem:[#allocation2 + $0x1a4] ss:$40 sps:$4 sm:$0xff]  }
 0x12f   : > { %v400_v1 = vadd.f32 %v399_v0, %v261_v18  ;;  %v401_v2 = vpop.f32.mrb[15].mxu0  ;;  %v3063_v0 = vld [vmem:[#allocation2 + $0x1a0] ss:$40 sps:$4 sm:$0xff]  }
 0x130   : > { %v3182_v3 = vpop.eup %3181  ;;  %v402_v4 = vadd.f32 %v401_v2, %v265_v20 }
 0x131   : > { %v3184_v5 = vpop.eup %3183  ;;  %v446_v6 = vadd.bf16 1065369472, %v3182_v3  ;;  %v3652_v7 = vpack.c.bf16 %v400_v1, %v396_v61  ;;  %v3066_v1 = vld [vmem:[#allocation2 + $0x1a8] ss:$40 sps:$4 sm:$0xff]   ;;  %v3071_v3 = vld [vmem:[#allocation2 + $0x1f4] ss:$40 sps:$4 sm:$0xff]  }
 0x132   : > { %v447_v8 = vadd.bf16 1065369472, %v3184_v5  ;;  %v3654_v9 = vpack.c.bf16 %v402_v4, %v398_v63  ;;  %v3068_v63 = vld [vmem:[#allocation2 + $0x1ac] ss:$40 sps:$4 sm:$0xff]   ;;  %v3074_v4 = vld [vmem:[#allocation2 + $0x1fc] ss:$40 sps:$4 sm:$0xff]  }
 0x133   : > { %3193 = vrcp.bf16 %v446_v6  ;;  %v2631_v10 = vmul.bf16 3216621497, %v3652_v7 }
 0x134   : > { %3195 = vrcp.bf16 %v447_v8  ;;  %v2632_v11 = vmul.bf16 3216621497, %v3654_v9  ;;  %v3069_v8 = vld [vmem:[#allocation2 + $0x1f0] ss:$40 sps:$4 sm:$0xff]  }
 0x135   : > { %3197 = vpow.bf16 %v2631_v10  ;;  %v3072_v10 = vld [vmem:[#allocation2 + $0x1f8] ss:$40 sps:$4 sm:$0xff]  }
 0x136   : > { %v3186_v12 = vpop.eup %3185  ;;  %3199 = vpow.bf16 %v2632_v11 }
 0x137   : > { %v3188_v16 = vpop.eup %3187  ;;  %v453_v18 = vmul.bf16 1065369472, %v3186_v12  ;;  %v3077_v12 = vld [vmem:[#allocation2 + $0x244] ss:$40 sps:$4 sm:$0xff]  }
 0x138   : > { %v3190_v19 = vpop.eup %3189  ;;  %v455_v20 = vmul.bf16 1065369472, %v3188_v16  ;;  %v3080_v16 = vld [vmem:[#allocation2 + $0x24c] ss:$40 sps:$4 sm:$0xff]  }
 0x139   : > { %v3192_v21 = vpop.eup %3191  ;;  %v448_v22 = vadd.bf16 1065369472, %v3190_v19  ;;  %v3662_v27 = vmul.bf16 %v453_v18, %v3634_v28  ;;  %v3078_v18 = vld [vmem:[#allocation2 + $0x248] ss:$40 sps:$4 sm:$0xff]   ;;  %v3086_v19 = vld [vmem:[#allocation2 + $0x29c] ss:$40 sps:$4 sm:$0xff]  }
 0x13a   : > { %v3659_v23 = vmul.bf16 %v455_v20, %v3636_v29  ;;  %v449_v24 = vadd.bf16 1065369472, %v3192_v21  ;;  %v3081_v20 = vld [vmem:[#allocation2 + $0x290] ss:$40 sps:$4 sm:$0xff]  }
 0x13b   : > { %3201 = vrcp.bf16 %v448_v22  ;;  %v3084_v21 = vld [vmem:[#allocation2 + $0x298] ss:$40 sps:$4 sm:$0xff]   ;;  %v3089_v22 = vld [vmem:[#allocation2 + $0x2e4] ss:$40 sps:$4 sm:$0xff]  }
 0x13c   : > { %3203 = vrcp.bf16 %v449_v24  ;;  %1522 = vmatprep.mubr.bf16.mxu1 %v3659_v23  ;;  %1595 = vmatprep.mubr.bf16.mxu0 %v3659_v23  ;;  %v3092_v24 = vld [vmem:[#allocation2 + $0x2ec] ss:$40 sps:$4 sm:$0xff]  }
 0x13d   : > { %1523 = vmatmul.mubr.bf16.vlgmr.msra.gmra.mrb[0].mxu1 %v3662_v27  ;;  %1596 = vmatmul.mubr.bf16.vlgmr.msra.gmra.mrb[16].mxu0 %v3662_v27 }
 0x13e   : > { %v3194_v29 = vpop.eup %3193  ;;  %1637 = vmatpush1.bf16.msra.mxu1 %v3033_v25  ;;  %1710 = vmatpush1.bf16.msra.mxu0 %v3036_v26  ;;  %v3087_v25 = vld [vmem:[#allocation2 + $0x2e0] ss:$40 sps:$4 sm:$0xff]  }
 0x13f   : > { %v3196_v34 = vpop.eup %3195  ;;  %v457_v28 = vmul.bf16 1065369472, %v3194_v29  ;;  %1638 = vmatprep.subr.bf16.mxu1 %v3041_v30  ;;  %1711 = vmatprep.subr.bf16.mxu0 %v3044_v31  ;;  %v3090_v26 = vld [vmem:[#allocation2 + $0x2e8] ss:$40 sps:$4 sm:$0xff]   ;;  %v3095_v30 = vld [vmem:[#allocation2 + $0x334] ss:$40 sps:$4 sm:$0xff]  }
 0x140   : > { %v3198_v37 = vpop.eup %3197  ;;  %v459_v38 = vmul.bf16 1065369472, %v3196_v34  ;;  %v3098_v31 = vld [vmem:[#allocation2 + $0x33c] ss:$40 sps:$4 sm:$0xff]   ;;  %v3093_v29 = vld [vmem:[#allocation2 + $0x330] ss:$40 sps:$4 sm:$0xff]  }
 0x141   : > { %v3200_v39 = vpop.eup %3199  ;;  %v450_v42 = vadd.bf16 1065369472, %v3198_v37  ;;  %v3672_v47 = vmul.bf16 %v457_v28, %v3640_v40  ;;  %v3054_v40 = vld [vmem:[#allocation2 + $0x108] ss:$40 sps:$4 sm:$0xff]   ;;  %v3104_v34 = vld [vmem:[#allocation2 + $0x38c] ss:$40 sps:$4 sm:$0xff]  }
 0x142   : > { %v3669_v43 = vmul.bf16 %v459_v38, %v3642_v41  ;;  %v451_v44 = vadd.bf16 1065369472, %v3200_v39  ;;  %1639 = vmatpush1.bf16.msra.mxu1 %v3039_v32  ;;  %1712 = vmatpush1.bf16.msra.mxu0 %v3042_v33  ;;  %v3096_v32 = vld [vmem:[#allocation2 + $0x338] ss:$40 sps:$4 sm:$0xff]   ;;  %v3101_v33 = vld [vmem:[#allocation2 + $0x384] ss:$40 sps:$4 sm:$0xff]  }
 0x143   : > { %3205 = vrcp.bf16 %v450_v42  ;;  %1640 = vmatprep.subr.bf16.mxu1 %v3047_v35  ;;  %1713 = vmatprep.subr.bf16.mxu0 %v3050_v36  ;;  %v3099_v28 = vld [vmem:[#allocation2 + $0x380] ss:$40 sps:$4 sm:$0xff]   ;;  %v3107_v36 = vld [vmem:[#allocation2 + $0x3d4] ss:$40 sps:$4 sm:$0xff]   ;;  %v3105_v38 = vld [vmem:[#allocation2 + $0x3d0] ss:$40 sps:$4 sm:$0xff]  }
 0x144   : > { %3207 = vrcp.bf16 %v451_v44  ;;  %1532 = vmatprep.mubr.bf16.mxu1 %v3669_v43  ;;  %1605 = vmatprep.mubr.bf16.mxu0 %v3669_v43  ;;  %v3102_v35 = vld [vmem:[#allocation2 + $0x388] ss:$40 sps:$4 sm:$0xff]   ;;  %v3110_v37 = vld [vmem:[#allocation2 + $0x3dc] ss:$40 sps:$4 sm:$0xff]   ;;  %v3108_v39 = vld [vmem:[#allocation2 + $0x3d8] ss:$40 sps:$4 sm:$0xff]  }
 0x145   : > { %1533 = vmatmul.mubr.bf16.gmra.mrb[4].mxu1 %v3672_v47  ;;  %1606 = vmatmul.mubr.bf16.gmra.mrb[20].mxu0 %v3672_v47  ;;  %v3113_v42 = vld [vmem:[#allocation2 + $0x424] ss:$40 sps:$4 sm:$0xff]  }
 0x146   : > { %v3202_v41 = vpop.eup %3201  ;;  %1641 = vmatpush1.bf16.msra.mxu1 %v3045_v45  ;;  %1714 = vmatpush1.bf16.msra.mxu0 %v3048_v46  ;;  %v3116_v44 = vld [vmem:[#allocation2 + $0x42c] ss:$40 sps:$4 sm:$0xff]   ;;  %v3111_v45 = vld [vmem:[#allocation2 + $0x420] ss:$40 sps:$4 sm:$0xff]  }
 0x147   : > { %v3204_v51 = vpop.eup %3203  ;;  %v461_v52 = vmul.bf16 1065369472, %v3202_v41  ;;  %1642 = vmatprep.subr.bf16.mxu1 %v3053_v48  ;;  %1715 = vmatprep.subr.bf16.mxu0 %v3056_v49  ;;  %v3114_v46 = vld [vmem:[#allocation2 + $0x428] ss:$40 sps:$4 sm:$0xff]   ;;  %v3119_v48 = vld [vmem:[#allocation2 + $0x474] ss:$40 sps:$4 sm:$0xff]  }
 0x148   : > { %v463_v56 = vmul.bf16 1065369472, %v3204_v51  ;;  %v3122_v49 = vld [vmem:[#allocation2 + $0x47c] ss:$40 sps:$4 sm:$0xff]   ;;  %v3117_v41 = vld [vmem:[#allocation2 + $0x470] ss:$40 sps:$4 sm:$0xff]  }
 0x149   : > { %v3682_v61 = vmul.bf16 %v461_v52, %v3646_v55  ;;  %v3128_v51 = vld [vmem:[#allocation2 + $0x4cc] ss:$40 sps:$4 sm:$0xff]   ;;  %v3123_v52 = vld [vmem:[#allocation2 + $0x4c0] ss:$40 sps:$4 sm:$0xff]  }
 0x14a   : > { %v3679_v58 = vmul.bf16 %v463_v56, %v3648_v57  ;;  %1643 = vmatpush1.bf16.msra.mxu1 %v3051_v50  ;;  %1716 = vmatpush1.bf16.msra.mxu0 %v3054_v40  ;;  %v3120_v50 = vld [vmem:[#allocation2 + $0x478] ss:$40 sps:$4 sm:$0xff]   ;;  %v3125_v40 = vld [vmem:[#allocation2 + $0x4c4] ss:$40 sps:$4 sm:$0xff]  }
 0x14b   : > { %1644 = vmatprep.subr.bf16.mxu1 %v3059_v53  ;;  %1717 = vmatprep.subr.bf16.mxu0 %v3062_v54  ;;  %v3126_v53 = vld [vmem:[#allocation2 + $0x4c8] ss:$40 sps:$4 sm:$0xff]   ;;  %v3131_v54 = vld [vmem:[#allocation2 + $0x24] ss:$40 sps:$4 sm:$0xff]  }
 0x14c   : > { %1542 = vmatprep.mubr.bf16.mxu1 %v3679_v58  ;;  %1615 = vmatprep.mubr.bf16.mxu0 %v3679_v58  ;;  %v3129_v56 = vld [vmem:[#allocation2 + $0x20] ss:$40 sps:$4 sm:$0xff]  }
 0x14d   : > { %1543 = vmatmul.mubr.bf16.gmra.mrb[8].mxu1 %v3682_v61  ;;  %1616 = vmatmul.mubr.bf16.gmra.mrb[24].mxu0 %v3682_v61 }
 0x14e   : > { %v3206_v57 = vpop.eup %3205  ;;  %1645 = vmatpush1.bf16.msra.mxu1 %v3057_v59  ;;  %1718 = vmatpush1.bf16.msra.mxu0 %v3060_v60  ;;  %v3134_v59 = vld [vmem:[#allocation2 + $0x74] ss:$40 sps:$4 sm:$0xff]   ;;  %v3132_v60 = vld [vmem:[#allocation2 + $0x70] ss:$40 sps:$4 sm:$0xff]  }
 0x14f   : > { %v3208_v2 = vpop.eup %3207  ;;  %v465_v55 = vmul.bf16 1065369472, %v3206_v57  ;;  %1646 = vmatprep.subr.bf16.mxu1 %v3065_v62  ;;  %1719 = vmatprep.subr.bf16.mxu0 %v3068_v63  ;;  %v3137_v62 = vld [vmem:[#allocation2 + $0xc4] ss:$40 sps:$4 sm:$0xff]   ;;  %v3135_v63 = vld [vmem:[#allocation2 + $0xc0] ss:$40 sps:$4 sm:$0xff]  }
 0x150   : > { %v467_v5 = vmul.bf16 1065369472, %v3208_v2  ;;  %v3140_v57 = vld [vmem:[#allocation2 + $0x114] ss:$40 sps:$4 sm:$0xff]   ;;  %v3141_v2 = vld [vmem:[#allocation2 + $0x160] ss:$40 sps:$4 sm:$0xff]  }
 0x151   : > { %v3692_v11 = vmul.bf16 %v465_v55, %v3652_v7  ;;  %v3083_v7 = vld [vmem:[#allocation2 + $0x294] ss:$40 sps:$4 sm:$0xff]  }
 0x152   : > { %v3689_v6 = vmul.bf16 %v467_v5, %v3654_v9  ;;  %1647 = vmatpush1.bf16.msra.mxu1 %v3063_v0  ;;  %1720 = vmatpush1.bf16.msra.mxu0 %v3066_v1  ;;  %v3075_v9 = vld [vmem:[#allocation2 + $0x240] ss:$40 sps:$4 sm:$0xff]   ;;  %v3138_v0 = vld [vmem:[#allocation2 + $0x110] ss:$40 sps:$4 sm:$0xff]   ;;  %v3143_v1 = vld [vmem:[#allocation2 + $0x164] ss:$40 sps:$4 sm:$0xff]  }
 0x153   : > { %1648 = vmatprep.subr.bf16.mxu1 %v3071_v3  ;;  %1721 = vmatprep.subr.bf16.mxu0 %v3074_v4  ;;  %v3146_v55 = vld [vmem:[#allocation2 + $0x1b4] ss:$40 sps:$4 sm:$0xff]   ;;  %v3144_v3 = vld [vmem:[#allocation2 + $0x1b0] ss:$40 sps:$4 sm:$0xff]   ;;  %v3149_v4 = vld [vmem:[#allocation2 + $0x204] ss:$40 sps:$4 sm:$0xff]  }
 0x154   : > { %1552 = vmatprep.mubr.bf16.mxu1 %v3689_v6  ;;  %1625 = vmatprep.mubr.bf16.mxu0 %v3689_v6  ;;  %v3147_v5 = vld [vmem:[#allocation2 + $0x200] ss:$40 sps:$4 sm:$0xff]  }
 0x155   : > { %1553 = vmatmul.mubr.bf16.gmra.mrb[12].mxu1 %v3692_v11  ;;  %1626 = vmatmul.mubr.bf16.gmra.mrb[28].mxu0 %v3692_v11 }
 0x156   : > { %1649 = vmatpush1.bf16.msra.mxu1 %v3069_v8  ;;  %1722 = vmatpush1.bf16.msra.mxu0 %v3072_v10  ;;  %v3152_v8 = vld [vmem:[#allocation2 + $0x254] ss:$40 sps:$4 sm:$0xff]   ;;  %v3150_v10 = vld [vmem:[#allocation2 + $0x250] ss:$40 sps:$4 sm:$0xff]  }
 0x157   : > { %1668 = vmatprep.mubr.bf16.mxu1 %v3659_v23  ;;  %1741 = vmatprep.mubr.bf16.mxu0 %v3659_v23 }
 0x158   : > { %1650 = vmatprep.subr.bf16.mxu1 %v3077_v12  ;;  %1723 = vmatprep.subr.bf16.mxu0 %v3080_v16  ;;  %v3155_v12 = vld [vmem:[#allocation2 + $0x2a4] ss:$40 sps:$4 sm:$0xff]   ;;  %v3153_v16 = vld [vmem:[#allocation2 + $0x2a0] ss:$40 sps:$4 sm:$0xff]  }
 0x15a   : > { %1651 = vmatpush1.bf16.msra.mxu1 %v3075_v9  ;;  %1724 = vmatpush1.bf16.msra.mxu0 %v3078_v18  ;;  %v3158_v9 = vld [vmem:[#allocation2 + $0x2f4] ss:$40 sps:$4 sm:$0xff]   ;;  %v3156_v18 = vld [vmem:[#allocation2 + $0x2f0] ss:$40 sps:$4 sm:$0xff]  }
 0x15b   : > { %1652 = vmatprep.subr.bf16.mxu1 %v3083_v7  ;;  %1725 = vmatprep.subr.bf16.mxu0 %v3086_v19  ;;  %v3164_v7 = vld [vmem:[#allocation2 + $0x394] ss:$40 sps:$4 sm:$0xff]   ;;  %v3162_v19 = vld [vmem:[#allocation2 + $0x390] ss:$40 sps:$4 sm:$0xff]  }
 0x15e   : > { %1653 = vmatpush1.bf16.msra.mxu1 %v3081_v20  ;;  %1726 = vmatpush1.bf16.msra.mxu0 %v3084_v21  ;;  %v3167_v20 = vld [vmem:[#allocation2 + $0x3e4] ss:$40 sps:$4 sm:$0xff]   ;;  %v3165_v21 = vld [vmem:[#allocation2 + $0x3e0] ss:$40 sps:$4 sm:$0xff]  }
 0x15f   : > { %1654 = vmatprep.subr.bf16.mxu1 %v3089_v22  ;;  %1727 = vmatprep.subr.bf16.mxu0 %v3092_v24  ;;  %v3170_v22 = vld [vmem:[#allocation2 + $0x434] ss:$40 sps:$4 sm:$0xff]   ;;  %v3168_v24 = vld [vmem:[#allocation2 + $0x430] ss:$40 sps:$4 sm:$0xff]  }
 0x162   : > { %1655 = vmatpush1.bf16.msra.mxu1 %v3087_v25  ;;  %1728 = vmatpush1.bf16.msra.mxu0 %v3090_v26  ;;  %v3173_v25 = vld [vmem:[#allocation2 + $0x484] ss:$40 sps:$4 sm:$0xff]   ;;  %v3171_v26 = vld [vmem:[#allocation2 + $0x480] ss:$40 sps:$4 sm:$0xff]  }
 0x163   : > { %1656 = vmatprep.subr.bf16.mxu1 %v3095_v30  ;;  %1729 = vmatprep.subr.bf16.mxu0 %v3098_v31  ;;  %v3176_v30 = vld [vmem:[#allocation2 + $0x4d4] ss:$40 sps:$4 sm:$0xff]   ;;  %v3174_v31 = vld [vmem:[#allocation2 + $0x4d0] ss:$40 sps:$4 sm:$0xff]  }
 0x166   : > { %1657 = vmatpush1.bf16.msra.mxu1 %v3093_v29  ;;  %1730 = vmatpush1.bf16.msra.mxu0 %v3096_v32  ;;  %v650_v29 = vsub.s32 2, %v3621_v14  ;;  %v3726_v32 = vld [vmem:[%s4100_s4] sm:$0xff] }
 0x167   : > { %1658 = vmatprep.subr.bf16.mxu1 %v3101_v33  ;;  %1731 = vmatprep.subr.bf16.mxu0 %v3104_v34  ;;  %v654_v33 = vsub.s32 3, %v3621_v14 }
 0x16a   : > { %1659 = vmatpush1.bf16.msra.mxu1 %v3099_v28  ;;  %1732 = vmatpush1.bf16.msra.mxu0 %v3102_v35 }
 0x16b   : > { %1660 = vmatprep.subr.bf16.mxu1 %v3107_v36  ;;  %1733 = vmatprep.subr.bf16.mxu0 %v3110_v37 }
 0x16e   : > { %1661 = vmatpush1.bf16.msra.mxu1 %v3105_v38  ;;  %1734 = vmatpush1.bf16.msra.mxu0 %v3108_v39 }
 0x16f   : > { %1662 = vmatprep.subr.bf16.mxu1 %v3113_v42  ;;  %1735 = vmatprep.subr.bf16.mxu0 %v3116_v44 }
 0x172   : > { %1663 = vmatpush1.bf16.msra.mxu1 %v3111_v45  ;;  %1736 = vmatpush1.bf16.msra.mxu0 %v3114_v46 }
 0x173   : > { %1664 = vmatprep.subr.bf16.mxu1 %v3119_v48  ;;  %1737 = vmatprep.subr.bf16.mxu0 %v3122_v49 }
 0x176   : > { %1665 = vmatpush1.bf16.msra.mxu1 %v3117_v41  ;;  %1738 = vmatpush1.bf16.msra.mxu0 %v3120_v50 }
 0x177   : > { %1666 = vmatprep.subr.bf16.mxu1 %v3125_v40  ;;  %1739 = vmatprep.subr.bf16.mxu0 %v3128_v51 }
 0x17a   : > { %1667 = vmatpush1.bf16.msra.mxu1 %v3123_v52  ;;  %1740 = vmatpush1.bf16.msra.mxu0 %v3126_v53 }
 0x17b   : > { %1782 = vmatprep.subr.bf16.mxu0 %v3131_v54  ;;  %2836 = vmatprep.subr.bf16.mxu1 %v3131_v54 }
 0x17d   : > { %1669 = vmatmul.mubr.bf16.vlgmr.msra.gmra.mrb[16].mxu1 %v3662_v27  ;;  %1742 = vmatmul.mubr.bf16.vlgmr.msra.gmra.mrb[32].mxu0 %v3662_v27 }
 0x17e   : > { %1678 = vmatprep.mubr.bf16.mxu1 %v3669_v43  ;;  %1751 = vmatprep.mubr.bf16.mxu0 %v3669_v43 }
 0x17f   : > { %1783 = vmatpush1.bf16.msra.mxu0 %v3129_v56  ;;  %2852 = vmatpush1.bf16.msra.mxu1 %v3129_v56 }
 0x180   : > { %1784 = vmatprep.subr.bf16.mxu0 %v3134_v59  ;;  %2837 = vmatprep.subr.bf16.mxu1 %v3134_v59 }
 0x183   : > { %1785 = vmatpush1.bf16.msra.mxu0 %v3132_v60  ;;  %2853 = vmatpush1.bf16.msra.mxu1 %v3132_v60 }
 0x184   : > { %1786 = vmatprep.subr.bf16.mxu0 %v3137_v62  ;;  %2838 = vmatprep.subr.bf16.mxu1 %v3137_v62 }
 0x185   : > { %1679 = vmatmul.mubr.bf16.gmra.mrb[20].mxu1 %v3672_v47  ;;  %1752 = vmatmul.mubr.bf16.gmra.mrb[36].mxu0 %v3672_v47 }
 0x186   : > { %1688 = vmatprep.mubr.bf16.mxu1 %v3679_v58  ;;  %1761 = vmatprep.mubr.bf16.mxu0 %v3679_v58 }
 0x187   : > { %1787 = vmatpush1.bf16.msra.mxu0 %v3135_v63  ;;  %2854 = vmatpush1.bf16.msra.mxu1 %v3135_v63 }
 0x188   : > { %1788 = vmatprep.subr.bf16.mxu0 %v3140_v57  ;;  %2839 = vmatprep.subr.bf16.mxu1 %v3140_v57 }
 0x18b   : > { %1789 = vmatpush1.bf16.msra.mxu0 %v3138_v0  ;;  %2855 = vmatpush1.bf16.msra.mxu1 %v3138_v0 }
 0x18c   : > { %1790 = vmatprep.subr.bf16.mxu0 %v3143_v1  ;;  %2840 = vmatprep.subr.bf16.mxu1 %v3143_v1 }
 0x18d   : > { %1689 = vmatmul.mubr.bf16.gmra.mrb[24].mxu1 %v3682_v61  ;;  %1762 = vmatmul.mubr.bf16.gmra.mrb[40].mxu0 %v3682_v61 }
 0x18e   : > { %1698 = vmatprep.mubr.bf16.mxu1 %v3689_v6  ;;  %1771 = vmatprep.mubr.bf16.mxu0 %v3689_v6 }
 0x18f   : > { %1791 = vmatpush1.bf16.msra.mxu0 %v3141_v2  ;;  %2856 = vmatpush1.bf16.msra.mxu1 %v3141_v2 }
 0x190   : > { %1792 = vmatprep.subr.bf16.mxu0 %v3146_v55  ;;  %2841 = vmatprep.subr.bf16.mxu1 %v3146_v55 }
 0x193   : > { %1793 = vmatpush1.bf16.msra.mxu0 %v3144_v3  ;;  %2857 = vmatpush1.bf16.msra.mxu1 %v3144_v3 }
 0x194   : > { %1794 = vmatprep.subr.bf16.mxu0 %v3149_v4  ;;  %2842 = vmatprep.subr.bf16.mxu1 %v3149_v4 }
 0x195   : > { %1699 = vmatmul.mubr.bf16.gmra.mrb[28].mxu1 %v3692_v11  ;;  %1772 = vmatmul.mubr.bf16.gmra.mrb[44].mxu0 %v3692_v11 }
 0x196   : > { %1814 = vmatprep.mubr.bf16.mxu0 %v3659_v23  ;;  %1824 = vmatprep.mubr.bf16.mxu1 %v3669_v43  ;;  %v3161_v23 = vld [vmem:[#allocation2 + $0x344] ss:$40 sps:$4 sm:$0xff]   ;;  %v3159_v43 = vld [vmem:[#allocation2 + $0x340] ss:$40 sps:$4 sm:$0xff]  }
 0x197   : > { %1795 = vmatpush1.bf16.msra.mxu0 %v3147_v5  ;;  %2858 = vmatpush1.bf16.msra.mxu1 %v3147_v5 }
 0x198   : > { %1796 = vmatprep.subr.bf16.mxu0 %v3152_v8  ;;  %2843 = vmatprep.subr.bf16.mxu1 %v3152_v8 }
 0x19b   : > { %1797 = vmatpush1.bf16.msra.mxu0 %v3150_v10  ;;  %2859 = vmatpush1.bf16.msra.mxu1 %v3150_v10 }
 0x19c   : > { %1798 = vmatprep.subr.bf16.mxu0 %v3155_v12  ;;  %2844 = vmatprep.subr.bf16.mxu1 %v3155_v12 }
 0x19f   : > { %1799 = vmatpush1.bf16.msra.mxu0 %v3153_v16  ;;  %2860 = vmatpush1.bf16.msra.mxu1 %v3153_v16 }
 0x1a0   : > { %1800 = vmatprep.subr.bf16.mxu0 %v3158_v9  ;;  %2845 = vmatprep.subr.bf16.mxu1 %v3158_v9 }
 0x1a3   : > { %1801 = vmatpush1.bf16.msra.mxu0 %v3156_v18  ;;  %2861 = vmatpush1.bf16.msra.mxu1 %v3156_v18 }
 0x1a4   : > { %1802 = vmatprep.subr.bf16.mxu0 %v3161_v23  ;;  %2846 = vmatprep.subr.bf16.mxu1 %v3161_v23 }
 0x1a7   : > { %1803 = vmatpush1.bf16.msra.mxu0 %v3159_v43  ;;  %2862 = vmatpush1.bf16.msra.mxu1 %v3159_v43 }
 0x1a8   : > { %1804 = vmatprep.subr.bf16.mxu0 %v3164_v7  ;;  %2847 = vmatprep.subr.bf16.mxu1 %v3164_v7 }
 0x1ab   : > { %1805 = vmatpush1.bf16.msra.mxu0 %v3162_v19  ;;  %2863 = vmatpush1.bf16.msra.mxu1 %v3162_v19 }
 0x1ac   : > { %1806 = vmatprep.subr.bf16.mxu0 %v3167_v20  ;;  %2848 = vmatprep.subr.bf16.mxu1 %v3167_v20 }
 0x1af   : > { %1807 = vmatpush1.bf16.msra.mxu0 %v3165_v21  ;;  %2864 = vmatpush1.bf16.msra.mxu1 %v3165_v21 }
 0x1b0   : > { %1808 = vmatprep.subr.bf16.mxu0 %v3170_v22  ;;  %2849 = vmatprep.subr.bf16.mxu1 %v3170_v22 }
 0x1b3   : > { %1809 = vmatpush1.bf16.msra.mxu0 %v3168_v24  ;;  %2865 = vmatpush1.bf16.msra.mxu1 %v3168_v24 }
 0x1b4   : > { %1810 = vmatprep.subr.bf16.mxu0 %v3173_v25  ;;  %2850 = vmatprep.subr.bf16.mxu1 %v3173_v25 }
 0x1b7   : > { %1811 = vmatpush1.bf16.msra.mxu0 %v3171_v26  ;;  %2866 = vmatpush1.bf16.msra.mxu1 %v3171_v26 }
 0x1b8   : > { %1812 = vmatprep.subr.bf16.mxu0 %v3176_v30  ;;  %2851 = vmatprep.subr.bf16.mxu1 %v3176_v30 }
 0x1bb   : > { %1813 = vmatpush1.bf16.msra.mxu0 %v3174_v31  ;;  %2867 = vmatpush1.bf16.msra.mxu1 %v3174_v31 }
 0x1be   : > { %1815 = vmatmul.mubr.bf16.vlgmr.msra.gmra.mrb[48].mxu0 %v3662_v27  ;;  %1825 = vmatmul.mubr.bf16.vlgmr.msra.gmra.mrb[32].mxu1 %v3672_v47  ;;  %v3731_v27 = vrot.slane %v3726_v32, %v3624_v15  ;;  %v3734_v47 = vrot.slane %v3726_v32, %v650_v29 }
 0x1bf   : > { %1834 = vmatprep.mubr.bf16.mxu1 %v3679_v58 }
 0x1c6   : > { %1835 = vmatmul.mubr.bf16.gmra.mrb[36].mxu1 %v3682_v61 }
 0x1c7   : > { %1844 = vmatprep.mubr.bf16.mxu1 %v3689_v6  ;;  %v3738_v6 = vrot.slane %v3726_v32, %v3630_v17 }
 0x1ce   : > { %1845 = vmatmul.mubr.bf16.gmra.mrb[40].mxu1 %v3692_v11  ;;  %v3741_v11 = vrot.slane %v3726_v32, %v654_v33 }
 0x210   : > { %v1524_v58 = vpop.f32.mrb[0].mxu1  ;;  %v1597_v61 = vpop.f32.mrb[16].mxu0 }
 0x211   : > { %v1526_v34 = vpop.f32.mrb[1].mxu1  ;;  %v1599_v28 = vpop.f32.mrb[17].mxu0  ;;  %v1525_v37 = vadd.f32 %v1524_v58, %v3731_v27  ;;  %v1598_v38 = vadd.f32 %v1597_v61, %v3734_v47 }
 0x212   : > { %v1528_v35 = vpop.f32.mrb[2].mxu1  ;;  %v1601_v36 = vpop.f32.mrb[18].mxu0  ;;  %v1527_v46 = vadd.f32 %v1526_v34, %v3738_v6  ;;  %v1600_v48 = vadd.f32 %v1599_v28, %v3741_v11 }
 0x213   : > { %v1529_v39 = vadd.f32 %v1528_v35, %v3731_v27  ;;  %v1602_v42 = vadd.f32 %v1601_v36, %v3734_v47  ;;  %v1530_v44 = vpop.f32.mrb[3].mxu1  ;;  %v1603_v45 = vpop.f32.mrb[19].mxu0 }
 0x214   : > { %v1531_v49 = vadd.f32 %v1530_v44, %v3738_v6  ;;  %v1604_v41 = vadd.f32 %v1603_v45, %v3741_v11 }
 0x215   : > { %v3751_v50 = vpack.c.bf16 %v1529_v39, %v1525_v37  ;;  %v3753_v40 = vpack.c.bf16 %v1602_v42, %v1598_v38 }
 0x216   : > { %v3755_v51 = vpack.c.bf16 %v1531_v49, %v1527_v46  ;;  %v3757_v52 = vpack.c.bf16 %v1604_v41, %v1600_v48 }
 0x217   : > { %v2793_v53 = vmul.bf16 3216621497, %v3751_v50  ;;  %v2795_v54 = vmul.bf16 3216621497, %v3753_v40 }
 0x218   : > { %v2794_v56 = vmul.bf16 3216621497, %v3755_v51  ;;  %v2796_v59 = vmul.bf16 3216621497, %v3757_v52  ;;  %v1534_v60 = vpop.f32.mrb[4].mxu1  ;;  %v1607_v62 = vpop.f32.mrb[20].mxu0 }
 0x219   : > { %3209 = vpow.bf16 %v2793_v53  ;;  %v1536_v63 = vpop.f32.mrb[5].mxu1  ;;  %v1609_v57 = vpop.f32.mrb[21].mxu0  ;;  %v1535_v0 = vadd.f32 %v1534_v60, %v3731_v27  ;;  %v1608_v1 = vadd.f32 %v1607_v62, %v3734_v47 }
 0x21a   : > { %3211 = vpow.bf16 %v2795_v54  ;;  %v1538_v2 = vpop.f32.mrb[6].mxu1  ;;  %v1611_v55 = vpop.f32.mrb[22].mxu0  ;;  %v1537_v3 = vadd.f32 %v1536_v63, %v3738_v6  ;;  %v1610_v12 = vadd.f32 %v1609_v57, %v3741_v11 }
 0x21b   : > { %3213 = vpow.bf16 %v2794_v56  ;;  %v1539_v4 = vadd.f32 %v1538_v2, %v3731_v27  ;;  %v1612_v5 = vadd.f32 %v1611_v55, %v3734_v47  ;;  %v1540_v8 = vpop.f32.mrb[7].mxu1  ;;  %v1613_v10 = vpop.f32.mrb[23].mxu0 }
 0x21c   : > { %3215 = vpow.bf16 %v2796_v59  ;;  %v1541_v16 = vadd.f32 %v1540_v8, %v3738_v6  ;;  %v1614_v9 = vadd.f32 %v1613_v10, %v3741_v11 }
 0x21d   : > { %v3771_v18 = vpack.c.bf16 %v1539_v4, %v1535_v0  ;;  %v3773_v23 = vpack.c.bf16 %v1612_v5, %v1608_v1 }
 0x21e   : > { %v3775_v43 = vpack.c.bf16 %v1541_v16, %v1537_v3  ;;  %v3777_v7 = vpack.c.bf16 %v1614_v9, %v1610_v12 }
 0x21f   : > { %v2803_v19 = vmul.bf16 3216621497, %v3771_v18  ;;  %v2805_v20 = vmul.bf16 3216621497, %v3773_v23 }
 0x220   : > { %v2804_v21 = vmul.bf16 3216621497, %v3775_v43  ;;  %v2806_v22 = vmul.bf16 3216621497, %v3777_v7  ;;  %v1544_v24 = vpop.f32.mrb[8].mxu1  ;;  %v1617_v25 = vpop.f32.mrb[24].mxu0 }
 0x221   : > { %3217 = vpow.bf16 %v2803_v19  ;;  %v1546_v26 = vpop.f32.mrb[9].mxu1  ;;  %v1619_v30 = vpop.f32.mrb[25].mxu0  ;;  %v1545_v31 = vadd.f32 %v1544_v24, %v3731_v27  ;;  %v1618_v29 = vadd.f32 %v1617_v25, %v3734_v47 }
 0x222   : > { %3219 = vpow.bf16 %v2805_v20  ;;  %v1548_v33 = vpop.f32.mrb[10].mxu1  ;;  %v1621_v58 = vpop.f32.mrb[26].mxu0  ;;  %v1547_v61 = vadd.f32 %v1546_v26, %v3738_v6  ;;  %v1620_v38 = vadd.f32 %v1619_v30, %v3741_v11 }
 0x223   : > { %3221 = vpow.bf16 %v2804_v21  ;;  %v1549_v34 = vadd.f32 %v1548_v33, %v3731_v27  ;;  %v1622_v28 = vadd.f32 %v1621_v58, %v3734_v47  ;;  %v1550_v35 = vpop.f32.mrb[11].mxu1  ;;  %v1623_v36 = vpop.f32.mrb[27].mxu0 }
 0x224   : > { %v3210_v37 = vpop.eup %3209  ;;  %3223 = vpow.bf16 %v2806_v22  ;;  %v1551_v39 = vadd.f32 %v1550_v35, %v3738_v6  ;;  %v1624_v42 = vadd.f32 %v1623_v36, %v3741_v11 }
 0x225   : > { %v3212_v44 = vpop.eup %3211  ;;  %v2055_v45 = vadd.bf16 1065369472, %v3210_v37  ;;  %v3791_v46 = vpack.c.bf16 %v1549_v34, %v1545_v31  ;;  %v3793_v48 = vpack.c.bf16 %v1622_v28, %v1618_v29 }
 0x226   : > { %v3214_v49 = vpop.eup %3213  ;;  %v2057_v41 = vadd.bf16 1065369472, %v3212_v44  ;;  %v3795_v53 = vpack.c.bf16 %v1551_v39, %v1547_v61  ;;  %v3797_v54 = vpack.c.bf16 %v1624_v42, %v1620_v38 }
 0x227   : > { %v3216_v56 = vpop.eup %3215  ;;  %3225 = vrcp.bf16 %v2055_v45  ;;  %v2056_v59 = vadd.bf16 1065369472, %v3214_v49  ;;  %v2813_v60 = vmul.bf16 3216621497, %v3791_v46  ;;  %v2815_v63 = vmul.bf16 3216621497, %v3793_v48 }
 0x228   : > { %3227 = vrcp.bf16 %v2057_v41  ;;  %v2058_v62 = vadd.bf16 1065369472, %v3216_v56  ;;  %v2814_v57 = vmul.bf16 3216621497, %v3795_v53  ;;  %v1554_v0 = vpop.f32.mrb[12].mxu1  ;;  %v1627_v1 = vpop.f32.mrb[28].mxu0 }
 0x229   : > { %3229 = vrcp.bf16 %v2056_v59  ;;  %v2816_v2 = vmul.bf16 3216621497, %v3797_v54  ;;  %v1556_v55 = vpop.f32.mrb[13].mxu1  ;;  %v1629_v3 = vpop.f32.mrb[29].mxu0  ;;  %v1555_v4 = vadd.f32 %v1554_v0, %v3731_v27  ;;  %v1628_v5 = vadd.f32 %v1627_v1, %v3734_v47 }
 0x22a   : > { %3231 = vrcp.bf16 %v2058_v62  ;;  %v1557_v8 = vadd.f32 %v1556_v55, %v3738_v6  ;;  %v1558_v10 = vpop.f32.mrb[14].mxu1  ;;  %v1631_v12 = vpop.f32.mrb[30].mxu0  ;;  %v1630_v9 = vadd.f32 %v1629_v3, %v3741_v11 }
 0x22b   : > { %3233 = vpow.bf16 %v2813_v60  ;;  %v1559_v19 = vadd.f32 %v1558_v10, %v3731_v27  ;;  %v1632_v20 = vadd.f32 %v1631_v12, %v3734_v47  ;;  %v1560_v21 = vpop.f32.mrb[15].mxu1  ;;  %v1633_v22 = vpop.f32.mrb[31].mxu0 }
 0x22c   : > { %v3218_v16 = vpop.eup %3217  ;;  %3235 = vpow.bf16 %v2815_v63  ;;  %v1561_v26 = vadd.f32 %v1560_v21, %v3738_v6  ;;  %v1634_v30 = vadd.f32 %v1633_v22, %v3741_v11 }
 0x22d   : > { %v3220_v24 = vpop.eup %3219  ;;  %v2065_v25 = vadd.bf16 1065369472, %v3218_v16  ;;  %3237 = vpow.bf16 %v2814_v57  ;;  %v3811_v33 = vpack.c.bf16 %v1559_v19, %v1555_v4  ;;  %v3813_v58 = vpack.c.bf16 %v1632_v20, %v1628_v5 }
 0x22e   : > { %v3222_v31 = vpop.eup %3221  ;;  %v2067_v29 = vadd.bf16 1065369472, %v3220_v24  ;;  %3239 = vpow.bf16 %v2816_v2  ;;  %v3815_v47 = vpack.c.bf16 %v1561_v26, %v1557_v8  ;;  %v3817_v34 = vpack.c.bf16 %v1634_v30, %v1630_v9 }
 0x22f   : > { %v3224_v61 = vpop.eup %3223  ;;  %3241 = vrcp.bf16 %v2065_v25  ;;  %v2066_v27 = vadd.bf16 1065369472, %v3222_v31  ;;  %v2823_v6 = vmul.bf16 3216621497, %v3811_v33  ;;  %v2825_v11 = vmul.bf16 3216621497, %v3813_v58 }
 0x230   : > { %3243 = vrcp.bf16 %v2067_v29  ;;  %v2068_v28 = vadd.bf16 1065369472, %v3224_v61  ;;  %v2824_v35 = vmul.bf16 3216621497, %v3815_v47  ;;  %v2826_v37 = vmul.bf16 3216621497, %v3817_v34 }
 0x231   : > { %3245 = vrcp.bf16 %v2066_v27 }
 0x232   : > { %v3226_v36 = vpop.eup %3225  ;;  %3247 = vrcp.bf16 %v2068_v28 }
 0x233   : > { %v3228_v38 = vpop.eup %3227  ;;  %v2096_v39 = vmul.bf16 1065369472, %v3226_v36  ;;  %3249 = vpow.bf16 %v2823_v6 }
 0x234   : > { %v3230_v42 = vpop.eup %3229  ;;  %v2100_v44 = vmul.bf16 1065369472, %v3228_v38  ;;  %3251 = vpow.bf16 %v2825_v11 }
 0x235   : > { %v3232_v45 = vpop.eup %3231  ;;  %v2175_v49 = vmul.bf16 %v2096_v39, %v3751_v50  ;;  %v2098_v41 = vmul.bf16 1065369472, %v3230_v42  ;;  %3253 = vpow.bf16 %v2824_v35 }
 0x236   : > { %v3234_v56 = vpop.eup %3233  ;;  %v2177_v59 = vmul.bf16 %v2100_v44, %v3753_v40  ;;  %v2102_v60 = vmul.bf16 1065369472, %v3232_v45  ;;  %3255 = vpow.bf16 %v2826_v37 }
 0x237   : > { %v3236_v62 = vpop.eup %3235  ;;  %v2176_v63 = vmul.bf16 %v2098_v41, %v3755_v51  ;;  %v2075_v57 = vadd.bf16 1065369472, %v3234_v56  ;;  %v2215_v1 = vunpack.c.l.bf16 %v2175_v49  ;;  %v2225_v2 = vunpack.c.h.bf16 %v2175_v49 }
 0x238   : > { %v3238_v0 = vpop.eup %3237  ;;  %v2178_v55 = vmul.bf16 %v2102_v60, %v3757_v52  ;;  %v2077_v3 = vadd.bf16 1065369472, %v3236_v62  ;;  %v2217_v5 = vunpack.c.l.bf16 %v2177_v59  ;;  %v2227_v50 = vunpack.c.h.bf16 %v2177_v59 }
 0x239   : > { %v3240_v4 = vpop.eup %3239  ;;  %3257 = vrcp.bf16 %v2075_v57  ;;  %v2216_v10 = vunpack.c.l.bf16 %v2176_v63  ;;  %v2226_v12 = vunpack.c.h.bf16 %v2176_v63  ;;  %v2076_v51 = vadd.bf16 1065369472, %v3238_v0 }
 0x23a   : > { %v3242_v8 = vpop.eup %3241  ;;  %v2218_v40 = vunpack.c.l.bf16 %v2178_v55  ;;  %3259 = vrcp.bf16 %v2077_v3  ;;  %v2228_v9 = vunpack.c.h.bf16 %v2178_v55  ;;  %v2078_v20 = vadd.bf16 1065369472, %v3240_v4 }
 0x23b   : > { %v3244_v16 = vpop.eup %3243  ;;  %v2116_v19 = vmul.bf16 1065369472, %v3242_v8  ;;  %v2295_v22 = vadd.f32 %v2225_v2, %v2215_v1  ;;  %v2321_v52 = vadd.f32 %v2227_v50, %v2217_v5  ;;  %3261 = vrcp.bf16 %v2076_v51 }
 0x23c   : > { %v3246_v21 = vpop.eup %3245  ;;  %v2120_v24 = vmul.bf16 1065369472, %v3244_v16  ;;  %v2308_v29 = vadd.f32 %v2226_v12, %v2216_v10  ;;  %3263 = vrcp.bf16 %v2078_v20  ;;  %v2334_v6 = vadd.f32 %v2228_v9, %v2218_v40 }
 0x23d   : > { %v3248_v25 = vpop.eup %3247  ;;  %v2185_v26 = vmul.bf16 %v2116_v19, %v3771_v18  ;;  %v2118_v30 = vmul.bf16 1065369472, %v3246_v21  ;;  %v658_v8 = vsub.s32 4, %v3621_v14  ;;  %v666_v19 = vsub.s32 6, %v3621_v14 }
 0x23e   : > { %v3250_v31 = vpop.eup %3249  ;;  %v2187_v61 = vmul.bf16 %v2120_v24, %v3773_v23  ;;  %v2122_v27 = vmul.bf16 1065369472, %v3248_v25  ;;  %v662_v21 = vsub.s32 5, %v3621_v14 }
 0x23f   : > { %v3252_v28 = vpop.eup %3251  ;;  %v2235_v11 = vunpack.c.l.bf16 %v2185_v26  ;;  %v2186_v35 = vmul.bf16 %v2118_v30, %v3775_v43  ;;  %v2085_v36 = vadd.bf16 1065369472, %v3250_v31  ;;  %v2245_v38 = vunpack.c.h.bf16 %v2185_v26 }
 0x240   : > { %v3254_v37 = vpop.eup %3253  ;;  %v2237_v39 = vunpack.c.l.bf16 %v2187_v61  ;;  %v2188_v42 = vmul.bf16 %v2122_v27, %v3777_v7  ;;  %v2087_v18 = vadd.bf16 1065369472, %v3252_v28  ;;  %v2247_v49 = vunpack.c.h.bf16 %v2187_v61 }
 0x241   : > { %v3256_v44 = vpop.eup %3255  ;;  %v2296_v45 = vadd.f32 %v2295_v22, %v2235_v11  ;;  %v2236_v41 = vunpack.c.l.bf16 %v2186_v35  ;;  %3265 = vrcp.bf16 %v2085_v36  ;;  %v2246_v56 = vunpack.c.h.bf16 %v2186_v35 }
 0x242   : > { %v2322_v23 = vadd.f32 %v2321_v52, %v2237_v39  ;;  %v2238_v59 = vunpack.c.l.bf16 %v2188_v42  ;;  %3267 = vrcp.bf16 %v2087_v18  ;;  %v2086_v63 = vadd.bf16 1065369472, %v3254_v37 }
 0x243   : > { %v2297_v60 = vadd.f32 %v2296_v45, %v2245_v38  ;;  %v2309_v62 = vadd.f32 %v2308_v29, %v2236_v41  ;;  %v2088_v43 = vadd.bf16 1065369472, %v3256_v44  ;;  %v2248_v1 = vunpack.c.h.bf16 %v2188_v42 }
 0x244   : > { %v3258_v57 = vpop.eup %3257  ;;  %v2323_v0 = vadd.f32 %v2322_v23, %v2247_v49  ;;  %v2335_v2 = vadd.f32 %v2334_v6, %v2238_v59  ;;  %3269 = vrcp.bf16 %v2086_v63  ;;  %v670_v22 = vsub.s32 7, %v3621_v14 }
 0x245   : > { %v3260_v55 = vpop.eup %3259  ;;  %v2310_v7 = vadd.f32 %v2309_v62, %v2246_v56  ;;  %v2136_v3 = vmul.bf16 1065369472, %v3258_v57  ;;  %3271 = vrcp.bf16 %v2088_v43  ;;  %v3839_v52 = vrot.slane %v3726_v32, %v658_v8 }
 0x246   : > { %v2336_v4 = vadd.f32 %v2335_v2, %v2248_v1  ;;  %v2140_v5 = vmul.bf16 1065369472, %v3260_v55  ;;  %v3262_v10 = vpop.eup %3261  ;;  %v3469_v29 = vmov 1966171168   ;;  %v3845_v35 = vrot.slane %v3726_v32, %v666_v19 }
 0x247   : > { %v2195_v50 = vmul.bf16 %v2136_v3, %v3791_v46  ;;  %v3264_v40 = vpop.eup %3263  ;;  %v2138_v9 = vmul.bf16 1065369472, %v3262_v10  ;;  %v3842_v61 = vunpack.c.l.s4 %v3469_v29  ;;  %v3848_v38 = vrot.slane %v3726_v32, %v662_v21 }
 0x248   : > { %v2197_v12 = vmul.bf16 %v2140_v5, %v3793_v48  ;;  %v2142_v20 = vmul.bf16 1065369472, %v3264_v40  ;;  %v3852_v18 = vrot.slane %v3726_v32, %v670_v22 }
 0x249   : > { %v2255_v16 = vunpack.c.l.bf16 %v2195_v50  ;;  %v2265_v24 = vunpack.c.h.bf16 %v2195_v50  ;;  %v2196_v46 = vmul.bf16 %v2138_v9, %v3795_v53  ;;  %v2451_v59 = vunpack.c.0.s8 %v3842_v61 }
 0x24a   : > { %v2257_v51 = vunpack.c.l.bf16 %v2197_v12  ;;  %v2267_v48 = vunpack.c.h.bf16 %v2197_v12  ;;  %v2198_v31 = vmul.bf16 %v2142_v20, %v3797_v54 }
 0x24b   : > { %v2298_v25 = vadd.f32 %v2297_v60, %v2255_v16  ;;  %v2256_v6 = vunpack.c.l.bf16 %v2196_v46  ;;  %v2266_v39 = vunpack.c.h.bf16 %v2196_v46 }
 0x24c   : > { %v3266_v26 = vpop.eup %3265  ;;  %v2324_v30 = vadd.f32 %v2323_v0, %v2257_v51  ;;  %v2258_v53 = vunpack.c.l.bf16 %v2198_v31  ;;  %v2268_v45 = vunpack.c.h.bf16 %v2198_v31 }
 0x24d   : > { %v3268_v27 = vpop.eup %3267  ;;  %v2299_v28 = vadd.f32 %v2298_v25, %v2265_v24  ;;  %v2156_v11 = vmul.bf16 1065369472, %v3266_v26  ;;  %v2311_v42 = vadd.f32 %v2310_v7, %v2256_v6 }
 0x24e   : > { %v2325_v36 = vadd.f32 %v2324_v30, %v2267_v48  ;;  %v2160_v37 = vmul.bf16 1065369472, %v3268_v27  ;;  %v2337_v49 = vadd.f32 %v2336_v4, %v2258_v53 }
 0x24f   : > { %v2205_v54 = vmul.bf16 %v2156_v11, %v3811_v33  ;;  %v3270_v44 = vpop.eup %3269  ;;  %v2312_v62 = vadd.f32 %v2311_v42, %v2266_v39 }
 0x250   : > { %v2207_v41 = vmul.bf16 %v2160_v37, %v3813_v58  ;;  %v1670_v23 = vpop.f32.mrb[16].mxu1  ;;  %v1743_v56 = vpop.f32.mrb[32].mxu0  ;;  %v2158_v57 = vmul.bf16 1065369472, %v3270_v44  ;;  %v2338_v33 = vadd.f32 %v2337_v49, %v2268_v45 }
 0x251   : > { %v3272_v60 = vpop.eup %3271  ;;  %v2275_v63 = vunpack.c.l.bf16 %v2205_v54  ;;  %v2285_v43 = vunpack.c.h.bf16 %v2205_v54  ;;  %v1672_v0 = vpop.f32.mrb[17].mxu1  ;;  %v1671_v5 = vadd.f32 %v1670_v23, %v3839_v52  ;;  %v1744_v50 = vadd.f32 %v1743_v56, %v3845_v35 }
 0x252   : > { %v1745_v1 = vpop.f32.mrb[33].mxu0  ;;  %v2277_v2 = vunpack.c.l.bf16 %v2207_v41  ;;  %v2287_v32 = vunpack.c.h.bf16 %v2207_v41  ;;  %v2162_v55 = vmul.bf16 1065369472, %v3272_v60  ;;  %v1674_v7 = vpop.f32.mrb[18].mxu1  ;;  %v2206_v58 = vmul.bf16 %v2158_v57, %v3815_v47 }
 0x253   : > { %v1747_v3 = vpop.f32.mrb[34].mxu0  ;;  %v2300_v4 = vadd.f32 %v2299_v28, %v2275_v63  ;;  %v1676_v8 = vpop.f32.mrb[19].mxu1  ;;  %v1673_v16 = vadd.f32 %v1672_v0, %v3848_v38  ;;  %v1746_v9 = vadd.f32 %v1745_v1, %v3852_v18  ;;  %v1675_v21 = vadd.f32 %v1674_v7, %v3839_v52 }
 0x254   : > { %v1749_v10 = vpop.f32.mrb[35].mxu0  ;;  %v2326_v12 = vadd.f32 %v2325_v36, %v2277_v2  ;;  %v2208_v40 = vmul.bf16 %v2162_v55, %v3817_v34  ;;  %v2276_v51 = vunpack.c.l.bf16 %v2206_v58  ;;  %v2286_v20 = vunpack.c.h.bf16 %v2206_v58 }
 0x255   : > { %v2301_v19 = vadd.f32 %v2300_v4, %v2285_v43  ;;  %v1748_v25 = vadd.f32 %v1747_v3, %v3845_v35  ;;  %v3864_v48 = vpack.c.bf16 %v1675_v21, %v1671_v5  ;;  %v1677_v34 = vadd.f32 %v1676_v8, %v3848_v38 }
 0x256   : > { %v2327_v22 = vadd.f32 %v2326_v12, %v2287_v32  ;;  %v2278_v47 = vunpack.c.l.bf16 %v2208_v40  ;;  %v2288_v24 = vunpack.c.h.bf16 %v2208_v40  ;;  %v2313_v26 = vadd.f32 %v2312_v62, %v2276_v51 }
 0x257   : > { %v2302_v46 = vrot.slane %v2301_v19, 4  ;;  %v3867_v29 = vpack.c.bf16 %v1748_v25, %v1744_v50  ;;  %v1750_v27 = vadd.f32 %v1749_v10, %v3852_v18  ;;  %v2797_v53 = vmul.bf16 3216621497, %v3864_v48 }
 0x258   : > { %v2328_v30 = vrot.slane %v2327_v22, 4  ;;  %v2339_v31 = vadd.f32 %v2338_v33, %v2278_v47  ;;  %v1680_v28 = vpop.f32.mrb[20].mxu1  ;;  %v1753_v6 = vpop.f32.mrb[36].mxu0  ;;  %v2314_v36 = vadd.f32 %v2313_v26, %v2286_v20  ;;  %v3871_v37 = vpack.c.bf16 %v1677_v34, %v1673_v16 }
 0x259   : > { %v2303_v11 = vadd.f32 %v2302_v46, %v2301_v19  ;;  %v1682_v39 = vpop.f32.mrb[21].mxu1  ;;  %v1755_v42 = vpop.f32.mrb[37].mxu0  ;;  %v2799_v45 = vmul.bf16 3216621497, %v3867_v29  ;;  %v3874_v49 = vpack.c.bf16 %v1750_v27, %v1746_v9  ;;  %3273 = vpow.bf16 %v2797_v53 }
 0x25a   : > { %v2329_v54 = vadd.f32 %v2328_v30, %v2327_v22  ;;  %v2340_v44 = vadd.f32 %v2339_v31, %v2288_v24  ;;  %v1684_v41 = vpop.f32.mrb[22].mxu1  ;;  %v1757_v23 = vpop.f32.mrb[38].mxu0  ;;  %v2315_v60 = vrot.slane %v2314_v36, 4  ;;  %v2798_v62 = vmul.bf16 3216621497, %v3871_v37 }
 0x25b   : > { %v2304_v56 = vrot.slane %v2303_v11, 2  ;;  %v1686_v63 = vpop.f32.mrb[23].mxu1  ;;  %v1759_v43 = vpop.f32.mrb[39].mxu0  ;;  %3275 = vpow.bf16 %v2799_v45  ;;  %v2800_v1 = vmul.bf16 3216621497, %v3874_v49  ;;  %v1681_v32 = vadd.f32 %v1680_v28, %v3839_v52 }
 0x25c   : > { %v2330_v57 = vrot.slane %v2329_v54, 2  ;;  %v2341_v0 = vrot.slane %v2340_v44, 4  ;;  %v2316_v2 = vadd.f32 %v2315_v60, %v2314_v36  ;;  %3277 = vpow.bf16 %v2798_v62 }
 0x25d   : > { %v2305_v33 = vadd.f32 %v2304_v56, %v2303_v11  ;;  %3279 = vpow.bf16 %v2800_v1  ;;  %v1754_v3 = vadd.f32 %v1753_v6, %v3845_v35  ;;  %v1683_v5 = vadd.f32 %v1682_v39, %v3848_v38 }
 0x25e   : > { %v2331_v55 = vadd.f32 %v2330_v57, %v2329_v54  ;;  %v2342_v7 = vadd.f32 %v2341_v0, %v2340_v44  ;;  %v2317_v58 = vrot.slane %v2316_v2, 2  ;;  %v1756_v50 = vadd.f32 %v1755_v42, %v3852_v18 }
 0x25f   : > { %v2306_v4 = vrot.slane %v2305_v33, 1  ;;  %v1685_v12 = vadd.f32 %v1684_v41, %v3839_v52  ;;  %v1758_v40 = vadd.f32 %v1757_v23, %v3845_v35  ;;  %v1687_v20 = vadd.f32 %v1686_v63, %v3848_v38 }
 0x260   : > { %v2332_v8 = vrot.slane %v2331_v55, 1  ;;  %v2343_v10 = vrot.slane %v2342_v7, 2  ;;  %v1690_v16 = vpop.f32.mrb[24].mxu1  ;;  %v1763_v9 = vpop.f32.mrb[40].mxu0  ;;  %v2318_v51 = vadd.f32 %v2317_v58, %v2316_v2  ;;  %v1760_v21 = vadd.f32 %v1759_v43, %v3852_v18 }
 0x261   : > { %v2307_v19 = vadd.f32 %v2306_v4, %v2305_v33  ;;  %v1692_v22 = vpop.f32.mrb[25].mxu1  ;;  %v1765_v47 = vpop.f32.mrb[41].mxu0  ;;  %v3886_v46 = vpack.c.bf16 %v1685_v12, %v1681_v32  ;;  %v3888_v26 = vpack.c.bf16 %v1758_v40, %v1754_v3  ;;  %v3892_v28 = vpack.c.bf16 %v1687_v20, %v1683_v5 }
 0x262   : > { %v2333_v24 = vadd.f32 %v2332_v8, %v2331_v55  ;;  %v2344_v25 = vadd.f32 %v2343_v10, %v2342_v7  ;;  %v1694_v34 = vpop.f32.mrb[26].mxu1  ;;  %v1767_v30 = vpop.f32.mrb[42].mxu0  ;;  %v2319_v27 = vrot.slane %v2318_v51, 1  ;;  %v3894_v6 = vpack.c.bf16 %v1760_v21, %v1756_v50 }
 0x263   : > { %v3890_v31 = vmul.f32 0.015625, %v2307_v19  ;;  %v1696_v11 = vpop.f32.mrb[27].mxu1  ;;  %v1769_v36 = vpop.f32.mrb[43].mxu0  ;;  %v2807_v42 = vmul.bf16 3216621497, %v3886_v46  ;;  %v1691_v23 = vadd.f32 %v1690_v16, %v3839_v52  ;;  %v1764_v62 = vadd.f32 %v1763_v9, %v3845_v35 }
 0x264   : > { %v3896_v53 = vmul.f32 0.015625, %v2333_v24  ;;  %v2345_v39 = vrot.slane %v2344_v25, 1  ;;  %v2809_v54 = vmul.bf16 3216621497, %v3888_v26  ;;  %v2320_v44 = vadd.f32 %v2319_v27, %v2318_v51  ;;  %v3274_v56 = vpop.eup %3273 }
 0x265   : > { %v2808_v45 = vmul.bf16 3216621497, %v3892_v28  ;;  %v2810_v41 = vmul.bf16 3216621497, %v3894_v6  ;;  %3281 = vpow.bf16 %v2807_v42  ;;  %v1693_v63 = vadd.f32 %v1692_v22, %v3848_v38 }
 0x266   : > { %v2346_v60 = vadd.f32 %v2345_v39, %v2344_v25  ;;  %v3276_v43 = vpop.eup %3275  ;;  %v2426_v57 = vmul.f32 0.015625, %v2320_v44  ;;  %v2059_v0 = vadd.bf16 1065369472, %v3274_v56  ;;  %3283 = vpow.bf16 %v2809_v54 }
 0x267   : > { %v1766_v1 = vadd.f32 %v1765_v47, %v3852_v18  ;;  %v3278_v33 = vpop.eup %3277  ;;  %v2061_v32 = vadd.bf16 1065369472, %v3276_v43  ;;  %3285 = vpow.bf16 %v2808_v45  ;;  %v1695_v55 = vadd.f32 %v1694_v34, %v3839_v52 }
 0x268   : > { %v2428_v2 = vmul.f32 0.015625, %v2346_v60  ;;  %v1700_v7 = vpop.f32.mrb[28].mxu1  ;;  %v1773_v3 = vpop.f32.mrb[44].mxu0  ;;  %v2445_v58 = vcombine.low %v3890_v31, %v2426_v57  ;;  %3287 = vrcp.bf16 %v2059_v0  ;;  %v2060_v5 = vadd.bf16 1065369472, %v3278_v33 }
 0x269   : > { %v3280_v4 = vpop.eup %3279  ;;  %v1768_v50 = vadd.f32 %v1767_v30, %v3845_v35  ;;  %v1702_v8 = vpop.f32.mrb[29].mxu1  ;;  %3289 = vrcp.bf16 %v2061_v32  ;;  %v3910_v16 = vpack.c.bf16 %v1695_v55, %v1691_v23  ;;  %v1697_v20 = vadd.f32 %v1696_v11, %v3848_v38 }
 0x26a   : > { %v1775_v10 = vpop.f32.mrb[45].mxu0  ;;  %v2446_v12 = vcombine.low %v3896_v53, %v2428_v2  ;;  %v2062_v40 = vadd.bf16 1065369472, %v3280_v4  ;;  %v1704_v9 = vpop.f32.mrb[30].mxu1  ;;  %3291 = vrcp.bf16 %v2060_v5  ;;  %v1770_v21 = vadd.f32 %v1769_v36, %v3852_v18 }
 0x26b   : > { %v1777_v19 = vpop.f32.mrb[46].mxu0  ;;  %v3912_v51 = vpack.c.bf16 %v1768_v50, %v1764_v62  ;;  %v1706_v22 = vpop.f32.mrb[31].mxu1  ;;  %v2817_v24 = vmul.bf16 3216621497, %v3910_v16  ;;  %v1701_v25 = vadd.f32 %v1700_v7, %v3839_v52  ;;  %v3921_v34 = vsub.s32 %v2451_v59, %v3621_v14 }
 0x26c   : > { %v1779_v47 = vpop.f32.mrb[47].mxu0  ;;  %3293 = vrcp.bf16 %v2062_v40  ;;  %v3924_v31 = vpack.c.bf16 %v1697_v20, %v1693_v63  ;;  %v3926_v27 = vpack.c.bf16 %v1770_v21, %v1766_v1  ;;  %v1774_v11 = vadd.f32 %v1773_v3, %v3845_v35 }
 0x26d   : > { %3295 = vpow.bf16 %v2810_v41  ;;  %v2819_v30 = vmul.bf16 3216621497, %v3912_v51  ;;  %v1703_v36 = vadd.f32 %v1702_v8, %v3848_v38  ;;  %v1705_v53 = vadd.f32 %v1704_v9, %v3839_v52 }
 0x26e   : > { %3297 = vpow.bf16 %v2817_v24  ;;  %v2818_v39 = vmul.bf16 3216621497, %v3924_v31  ;;  %v2820_v14 = vmul.bf16 3216621497, %v3926_v27  ;;  %v1778_v61 = vadd.f32 %v1777_v19, %v3845_v35 }
 0x26f   : > { %3299 = vpow.bf16 %v2819_v30  ;;  %v3934_v59 = vpack.c.bf16 %v1705_v53, %v1701_v25  ;;  %v1707_v42 = vadd.f32 %v1706_v22, %v3848_v38  ;;  %v1780_v54 = vadd.f32 %v1779_v47, %v3852_v18 }
 0x270   : > { %v3939_v44 = vrot.slane %v2445_v58, %v3921_v34  ;;  %v3282_v45 = vpop.eup %3281  ;;  %3301 = vpow.bf16 %v2818_v39  ;;  %v1776_v52 = vadd.f32 %v1775_v10, %v3852_v18  ;;  %v3942_v41 = vpack.c.bf16 %v1778_v61, %v1774_v11 }
 0x271   : > { %v3945_v23 = vrot.slane %v2446_v12, %v3921_v34  ;;  %v3284_v56 = vpop.eup %3283  ;;  %v2069_v35 = vadd.bf16 1065369472, %v3282_v45  ;;  %3303 = vpow.bf16 %v2820_v14  ;;  %v3947_v60 = vpack.c.bf16 %v1707_v42, %v1703_v36 }
 0x272   : > { %v3286_v38 = vpop.eup %3285  ;;  %v2071_v62 = vadd.bf16 1065369472, %v3284_v56  ;;  %v2827_v63 = vmul.bf16 3216621497, %v3934_v59  ;;  %v3950_v43 = vpack.c.bf16 %v1780_v54, %v1776_v52  ;;  %v2829_v1 = vmul.bf16 3216621497, %v3942_v41 }
 0x273   : > { %v2477_v57 = vcombine.low %v3939_v44, %v3945_v23  ;;  %v3288_v18 = vpop.eup %3287  ;;  %3305 = vrcp.bf16 %v2069_v35  ;;  %v2070_v0 = vadd.bf16 1065369472, %v3286_v38  ;;  %v2828_v50 = vmul.bf16 3216621497, %v3947_v60 }
 0x274   : > { %v3290_v33 = vpop.eup %3289  ;;  %3307 = vrcp.bf16 %v2071_v62  ;;  %v2104_v55 = vmul.bf16 1065369472, %v3288_v18  ;;  %v2830_v12 = vmul.bf16 3216621497, %v3950_v43 }
 0x275   : > { %v3292_v2 = vpop.eup %3291  ;;  %3309 = vrcp.bf16 %v2070_v0  ;;  %v2108_v7 = vmul.bf16 1065369472, %v3290_v33 }
 0x276   : > { %3311 = vpow.bf16 %v2827_v63  ;;  %v2106_v58 = vmul.bf16 1065369472, %v3292_v2  ;;  %v2179_v40 = vmul.bf16 %v2104_v55, %v3864_v48 }
 0x277   : > { %v3294_v32 = vpop.eup %3293  ;;  %3313 = vpow.bf16 %v2829_v1  ;;  %v2181_v9 = vmul.bf16 %v2108_v7, %v3867_v29 }
 0x278   : > { %v3296_v3 = vpop.eup %3295  ;;  %v2110_v20 = vmul.bf16 1065369472, %v3294_v32  ;;  %v2180_v22 = vmul.bf16 %v2106_v58, %v3871_v37  ;;  %v2219_v11 = vunpack.c.l.bf16 %v2179_v40  ;;  %v2229_v36 = vunpack.c.h.bf16 %v2179_v40 }
 0x279   : > { %v3298_v4 = vpop.eup %3297  ;;  %v2072_v5 = vadd.bf16 1065369472, %v3296_v3  ;;  %v2221_v53 = vunpack.c.l.bf16 %v2181_v9  ;;  %v2231_v39 = vunpack.c.h.bf16 %v2181_v9 }
 0x27a   : > { %v3300_v8 = vpop.eup %3299  ;;  %v2079_v10 = vadd.bf16 1065369472, %v3298_v4  ;;  %v2182_v29 = vmul.bf16 %v2110_v20, %v3874_v49  ;;  %v2220_v42 = vunpack.c.l.bf16 %v2180_v22  ;;  %v2230_v54 = vunpack.c.h.bf16 %v2180_v22 }
 0x27b   : > { %3315 = vrcp.bf16 %v2072_v5  ;;  %v3302_v19 = vpop.eup %3301  ;;  %v2081_v47 = vadd.bf16 1065369472, %v3300_v8  ;;  %v2347_v38 = vadd.f32 %v2229_v36, %v2219_v11  ;;  %v2373_v18 = vadd.f32 %v2231_v39, %v2221_v53 }
 0x27c   : > { %3317 = vrcp.bf16 %v2079_v10  ;;  %v3304_v21 = vpop.eup %3303  ;;  %v2080_v24 = vadd.bf16 1065369472, %v3302_v19  ;;  %v2360_v33 = vadd.f32 %v2230_v54, %v2220_v42  ;;  %v2222_v2 = vunpack.c.l.bf16 %v2182_v29 }
 0x27d   : > { %3319 = vpow.bf16 %v2828_v50  ;;  %v2082_v25 = vadd.bf16 1065369472, %v3304_v21  ;;  %v2232_v58 = vunpack.c.h.bf16 %v2182_v29 }
 0x27e   : > { %3321 = vpow.bf16 %v2830_v12  ;;  %v3306_v30 = vpop.eup %3305 }
 0x27f   : > { %3323 = vrcp.bf16 %v2081_v47  ;;  %v3308_v48 = vpop.eup %3307  ;;  %v2124_v14 = vmul.bf16 1065369472, %v3306_v30  ;;  %v2386_v11 = vadd.f32 %v2232_v58, %v2222_v2 }
 0x280   : > { %3325 = vrcp.bf16 %v2080_v24  ;;  %v3310_v61 = vpop.eup %3309  ;;  %v2128_v37 = vmul.bf16 1065369472, %v3308_v48  ;;  %v637_v48 = vld [vmem:[%s4100_s4 + $0x8] sm:$0x3] }
 0x281   : > { %3327 = vrcp.bf16 %v2082_v25  ;;  %v3312_v45 = vpop.eup %3311  ;;  %v2189_v52 = vmul.bf16 %v2124_v14, %v3886_v46  ;;  %v2126_v56 = vmul.bf16 1065369472, %v3310_v61 }
 0x282   : > { %v3314_v35 = vpop.eup %3313  ;;  %v2191_v62 = vmul.bf16 %v2128_v37, %v3888_v26  ;;  %v2089_v63 = vadd.bf16 1065369472, %v3312_v45 }
 0x283   : > { %v2239_v0 = vunpack.c.l.bf16 %v2189_v52  ;;  %v2190_v49 = vmul.bf16 %v2126_v56, %v3892_v28  ;;  %v2091_v1 = vadd.bf16 1065369472, %v3314_v35  ;;  %v2249_v7 = vunpack.c.h.bf16 %v2189_v52 }
 0x284   : > { %v2241_v32 = vunpack.c.l.bf16 %v2191_v62  ;;  %3329 = vrcp.bf16 %v2089_v63  ;;  %v2251_v5 = vunpack.c.h.bf16 %v2191_v62  ;;  %v3972_v52 = vrot.slane %v637_v48, %v3624_v15 }
 0x285   : > { %v2348_v3 = vadd.f32 %v2347_v38, %v2239_v0  ;;  %v2240_v4 = vunpack.c.l.bf16 %v2190_v49  ;;  %3331 = vrcp.bf16 %v2091_v1  ;;  %v2250_v12 = vunpack.c.h.bf16 %v2190_v49 }
 0x286   : > { %v3316_v55 = vpop.eup %3315  ;;  %v2374_v50 = vadd.f32 %v2373_v18, %v2241_v32  ;;  %v3976_v62 = vrot.slane %v637_v48, %v3630_v17 }
 0x287   : > { %v3318_v46 = vpop.eup %3317  ;;  %v2130_v26 = vmul.bf16 1065369472, %v3316_v55  ;;  %v2349_v10 = vadd.f32 %v2348_v3, %v2249_v7  ;;  %v2361_v40 = vadd.f32 %v2360_v33, %v2240_v4 }
 0x288   : > { %v3320_v8 = vpop.eup %3319  ;;  %v2144_v28 = vmul.bf16 1065369472, %v3318_v46  ;;  %v2375_v19 = vadd.f32 %v2374_v50, %v2251_v5 }
 0x289   : > { %v3322_v9 = vpop.eup %3321  ;;  %v2192_v20 = vmul.bf16 %v2130_v26, %v3894_v6  ;;  %v2090_v21 = vadd.bf16 1065369472, %v3320_v8  ;;  %v2362_v47 = vadd.f32 %v2361_v40, %v2250_v12 }
 0x28a   : > { %v3324_v22 = vpop.eup %3323  ;;  %v2199_v24 = vmul.bf16 %v2144_v28, %v3910_v16  ;;  %v2092_v25 = vadd.bf16 1065369472, %v3322_v9 }
 0x28b   : > { %v3326_v30 = vpop.eup %3325  ;;  %v2242_v36 = vunpack.c.l.bf16 %v2192_v20  ;;  %v2148_v53 = vmul.bf16 1065369472, %v3324_v22  ;;  %3333 = vrcp.bf16 %v2090_v21  ;;  %v2252_v6 = vunpack.c.h.bf16 %v2192_v20 }
 0x28c   : > { %v3328_v39 = vpop.eup %3327  ;;  %v2259_v29 = vunpack.c.l.bf16 %v2199_v24  ;;  %v2146_v14 = vmul.bf16 1065369472, %v3326_v30  ;;  %3335 = vrcp.bf16 %v2092_v25  ;;  %v2269_v16 = vunpack.c.h.bf16 %v2199_v24 }
 0x28d   : > { %v2387_v61 = vadd.f32 %v2386_v11, %v2242_v36  ;;  %v2201_v42 = vmul.bf16 %v2148_v53, %v3912_v51  ;;  %v2150_v54 = vmul.bf16 1065369472, %v3328_v39 }
 0x28e   : > { %v2350_v37 = vadd.f32 %v2349_v10, %v2259_v29  ;;  %v2200_v45 = vmul.bf16 %v2146_v14, %v3924_v31 }
 0x28f   : > { %v2388_v56 = vadd.f32 %v2387_v61, %v2252_v6  ;;  %v2261_v35 = vunpack.c.l.bf16 %v2201_v42  ;;  %v2202_v38 = vmul.bf16 %v2150_v54, %v3926_v27  ;;  %v3330_v63 = vpop.eup %3329  ;;  %v2271_v0 = vunpack.c.h.bf16 %v2201_v42 }
 0x290   : > { %v2351_v18 = vadd.f32 %v2350_v37, %v2269_v16  ;;  %v2260_v49 = vunpack.c.l.bf16 %v2200_v45  ;;  %v2270_v51 = vunpack.c.h.bf16 %v2200_v45  ;;  %v3332_v1 = vpop.eup %3331  ;;  %v2164_v31 = vmul.bf16 1065369472, %v3330_v63 }
 0x291   : > { %v2376_v33 = vadd.f32 %v2375_v19, %v2261_v35  ;;  %v2262_v2 = vunpack.c.l.bf16 %v2202_v38  ;;  %v2272_v32 = vunpack.c.h.bf16 %v2202_v38  ;;  %v1816_v55 = vpop.f32.mrb[48].mxu0  ;;  %v1826_v15 = vpop.f32.mrb[32].mxu1  ;;  %v2168_v3 = vmul.bf16 1065369472, %v3332_v1 }
 0x292   : > { %v2363_v7 = vadd.f32 %v2362_v47, %v2260_v49  ;;  %v1817_v4 = vadd.f32 %v1816_v55, %v3972_v52  ;;  %v1827_v27 = vadd.f32 %v1826_v15, %v3972_v52  ;;  %v1818_v17 = vpop.f32.mrb[49].mxu0  ;;  %v1828_v46 = vpop.f32.mrb[33].mxu1  ;;  %v2209_v50 = vmul.bf16 %v2164_v31, %v3934_v59 }
 0x293   : > { %v2377_v58 = vadd.f32 %v2376_v33, %v2271_v0  ;;  %v2389_v5 = vadd.f32 %v2388_v56, %v2262_v2  ;;  %v1819_v26 = vadd.f32 %v1818_v17, %v3976_v62  ;;  %v1820_v8 = vpop.f32.mrb[50].mxu0  ;;  %v1830_v10 = vpop.f32.mrb[34].mxu1  ;;  %v2211_v40 = vmul.bf16 %v2168_v3, %v3942_v41 }
 0x294   : > { %v2364_v12 = vadd.f32 %v2363_v7, %v2270_v51  ;;  %v1829_v28 = vadd.f32 %v1828_v46, %v3976_v62  ;;  %v1821_v9 = vadd.f32 %v1820_v8, %v3972_v52  ;;  %v1822_v19 = vpop.f32.mrb[51].mxu0  ;;  %v1832_v20 = vpop.f32.mrb[35].mxu1  ;;  %v2279_v22 = vunpack.c.l.bf16 %v2209_v50 }
 0x295   : > { %v2390_v21 = vadd.f32 %v2389_v5, %v2272_v32  ;;  %v2289_v47 = vunpack.c.h.bf16 %v2209_v50  ;;  %v1831_v24 = vadd.f32 %v1830_v10, %v3972_v52  ;;  %v2281_v59 = vunpack.c.l.bf16 %v2211_v40 }
 0x296   : > { %v3334_v25 = vpop.eup %3333  ;;  %v2291_v30 = vunpack.c.h.bf16 %v2211_v40  ;;  %v3986_v11 = vpack.c.bf16 %v1821_v9, %v1817_v4  ;;  %v1823_v36 = vadd.f32 %v1822_v19, %v3976_v62  ;;  %v2352_v41 = vadd.f32 %v2351_v18, %v2279_v22 }
 0x297   : > { %v3336_v53 = vpop.eup %3335  ;;  %v2166_v48 = vmul.bf16 1065369472, %v3334_v25  ;;  %v3989_v39 = vpack.c.bf16 %v1831_v24, %v1827_v27  ;;  %v1833_v29 = vadd.f32 %v1832_v20, %v3976_v62  ;;  %v2378_v14 = vadd.f32 %v2377_v58, %v2281_v59 }
 0x298   : > { %v2170_v6 = vmul.bf16 1065369472, %v3336_v53  ;;  %v2801_v61 = vmul.bf16 3216621497, %v3986_v11  ;;  %v3993_v42 = vpack.c.bf16 %v1823_v36, %v1819_v26  ;;  %v2353_v54 = vadd.f32 %v2352_v41, %v2289_v47 }
 0x299   : > { %v2210_v16 = vmul.bf16 %v2166_v48, %v3947_v60  ;;  %v2811_v37 = vmul.bf16 3216621497, %v3989_v39  ;;  %v3997_v45 = vpack.c.bf16 %v1833_v29, %v1829_v28  ;;  %v1836_v56 = vpop.f32.mrb[36].mxu1  ;;  %v2379_v35 = vadd.f32 %v2378_v14, %v2291_v30 }
 0x29a   : > { %v2212_v38 = vmul.bf16 %v2170_v6, %v3950_v43  ;;  %3337 = vpow.bf16 %v2801_v61  ;;  %v2802_v63 = vmul.bf16 3216621497, %v3993_v42  ;;  %v1838_v18 = vpop.f32.mrb[37].mxu1  ;;  %v2354_v0 = vrot.slane %v2353_v54, 4 }
 0x29b   : > { %v2280_v49 = vunpack.c.l.bf16 %v2210_v16  ;;  %v2290_v51 = vunpack.c.h.bf16 %v2210_v16  ;;  %3339 = vpow.bf16 %v2811_v37  ;;  %v1840_v1 = vpop.f32.mrb[38].mxu1  ;;  %v2380_v33 = vrot.slane %v2379_v35, 4 }
 0x29c   : > { %v2282_v2 = vunpack.c.l.bf16 %v2212_v38  ;;  %v2292_v60 = vunpack.c.h.bf16 %v2212_v38  ;;  %3341 = vpow.bf16 %v2802_v63  ;;  %v1842_v32 = vpop.f32.mrb[39].mxu1  ;;  %v2355_v31 = vadd.f32 %v2354_v0, %v2353_v54 }
 0x29d   : > { %v2365_v55 = vadd.f32 %v2364_v12, %v2280_v49  ;;  %v2812_v15 = vmul.bf16 3216621497, %v3997_v45  ;;  %v1837_v43 = vadd.f32 %v1836_v56, %v3972_v52  ;;  %v2381_v7 = vadd.f32 %v2380_v33, %v2379_v35 }
 0x29e   : > { %v2391_v3 = vadd.f32 %v2390_v21, %v2282_v2  ;;  %v1839_v4 = vadd.f32 %v1838_v18, %v3976_v62  ;;  %v1841_v27 = vadd.f32 %v1840_v1, %v3972_v52  ;;  %v2356_v17 = vrot.slane %v2355_v31, 2 }
 0x29f   : > { %v2366_v46 = vadd.f32 %v2365_v55, %v2290_v51  ;;  %3343 = vpow.bf16 %v2812_v15  ;;  %v1843_v58 = vadd.f32 %v1842_v32, %v3976_v62  ;;  %v2382_v5 = vrot.slane %v2381_v7, 2 }
 0x2a0   : > { %v2392_v50 = vadd.f32 %v2391_v3, %v2292_v60  ;;  %v4006_v26 = vpack.c.bf16 %v1841_v27, %v1837_v43  ;;  %v2357_v8 = vadd.f32 %v2356_v17, %v2355_v31 }
 0x2a1   : > { %v2367_v10 = vrot.slane %v2366_v46, 4  ;;  %v4008_v12 = vpack.c.bf16 %v1843_v58, %v1839_v4  ;;  %v1846_v40 = vpop.f32.mrb[40].mxu1  ;;  %v2383_v28 = vadd.f32 %v2382_v5, %v2381_v7 }
 0x2a2   : > { %v2393_v9 = vrot.slane %v2392_v50, 4  ;;  %v2821_v19 = vmul.bf16 3216621497, %v4006_v26  ;;  %v1848_v20 = vpop.f32.mrb[41].mxu1  ;;  %v2358_v21 = vrot.slane %v2357_v8, 1  ;;  %v1847_v24 = vadd.f32 %v1846_v40, %v3972_v52 }
 0x2a3   : > { %v2368_v22 = vadd.f32 %v2367_v10, %v2366_v46  ;;  %v2822_v47 = vmul.bf16 3216621497, %v4008_v12  ;;  %v1850_v25 = vpop.f32.mrb[42].mxu1  ;;  %v2384_v59 = vrot.slane %v2383_v28, 1  ;;  %v1849_v29 = vadd.f32 %v1848_v20, %v3976_v62 }
 0x2a4   : > { %v2394_v30 = vadd.f32 %v2393_v9, %v2392_v50  ;;  %3345 = vpow.bf16 %v2821_v19  ;;  %v1851_v36 = vadd.f32 %v1850_v25, %v3972_v52  ;;  %v1852_v53 = vpop.f32.mrb[43].mxu1  ;;  %v2359_v56 = vadd.f32 %v2358_v21, %v2357_v8 }
 0x2a5   : > { %v3338_v41 = vpop.eup %3337  ;;  %v2369_v48 = vrot.slane %v2368_v22, 2  ;;  %3347 = vpow.bf16 %v2822_v47  ;;  %v1853_v14 = vadd.f32 %v1852_v53, %v3976_v62  ;;  %v2385_v52 = vadd.f32 %v2384_v59, %v2383_v28 }
 0x2a6   : > { %v3340_v6 = vpop.eup %3339  ;;  %v2395_v61 = vrot.slane %v2394_v30, 2  ;;  %v2063_v54 = vadd.bf16 1065369472, %v3338_v41  ;;  %v4016_v16 = vpack.c.bf16 %v1851_v36, %v1847_v24  ;;  %v2429_v2 = vmul.f32 0.015625, %v2359_v56 }
 0x2a7   : > { %v3342_v37 = vpop.eup %3341  ;;  %v2370_v35 = vadd.f32 %v2369_v48, %v2368_v22  ;;  %v2073_v38 = vadd.bf16 1065369472, %v3340_v6  ;;  %v4018_v63 = vpack.c.bf16 %v1853_v14, %v1849_v29  ;;  %v2431_v31 = vmul.f32 0.015625, %v2385_v52 }
 0x2a8   : > { %v2396_v18 = vadd.f32 %v2395_v61, %v2394_v30  ;;  %3349 = vrcp.bf16 %v2063_v54  ;;  %v2064_v0 = vadd.bf16 1065369472, %v3342_v37  ;;  %v2831_v51 = vmul.bf16 3216621497, %v4016_v16 }
 0x2a9   : > { %v2371_v49 = vrot.slane %v2370_v35, 1  ;;  %3351 = vrcp.bf16 %v2073_v38  ;;  %v2832_v62 = vmul.bf16 3216621497, %v4018_v63 }
 0x2aa   : > { %v3344_v1 = vpop.eup %3343  ;;  %v2397_v33 = vrot.slane %v2396_v18, 1  ;;  %3353 = vrcp.bf16 %v2064_v0 }
 0x2ab   : > { %v2372_v60 = vadd.f32 %v2371_v49, %v2370_v35  ;;  %v2074_v32 = vadd.bf16 1065369472, %v3344_v1  ;;  %3355 = vpow.bf16 %v2831_v51 }
 0x2ac   : > { %v2398_v55 = vadd.f32 %v2397_v33, %v2396_v18  ;;  %3357 = vpow.bf16 %v2832_v62 }
 0x2ad   : > { %v2430_v15 = vmul.f32 0.015625, %v2372_v60  ;;  %3359 = vrcp.bf16 %v2074_v32 }
 0x2ae   : > { %v2432_v43 = vmul.f32 0.015625, %v2398_v55 }
 0x2af   : > { %v3346_v7 = vpop.eup %3345  ;;  %v2447_v3 = vcombine.low %v2429_v2, %v2430_v15 }
 0x2b0   : > { %v3348_v4 = vpop.eup %3347  ;;  %v2448_v27 = vcombine.low %v2431_v31, %v2432_v43  ;;  %v2083_v17 = vadd.bf16 1065369472, %v3346_v7 }
 0x2b1   : > { %v2084_v46 = vadd.bf16 1065369472, %v3348_v4  ;;  %v2469_v58 = vrot.slane %v2447_v3, %v3921_v34 }
 0x2b2   : > { %3361 = vrcp.bf16 %v2083_v17  ;;  %v2476_v5 = vrot.slane %v2448_v27, %v3921_v34 }
 0x2b3   : > { %v3350_v50 = vpop.eup %3349  ;;  %3363 = vrcp.bf16 %v2084_v46 }
 0x2b4   : > { %v3352_v8 = vpop.eup %3351  ;;  %v2112_v10 = vmul.bf16 1065369472, %v3350_v50  ;;  %v2478_v40 = vcombine.low %v2469_v58, %v2476_v5 }
 0x2b5   : > { %v3354_v28 = vpop.eup %3353  ;;  %v2132_v9 = vmul.bf16 1065369472, %v3352_v8 }
 0x2b6   : > { %v3356_v19 = vpop.eup %3355  ;;  %v2183_v20 = vmul.bf16 %v2112_v10, %v3986_v11  ;;  %v2114_v21 = vmul.bf16 1065369472, %v3354_v28  ;;  %v2492_v25 = vrot.slane %v2478_v40, %v3921_v34  ;;  %v2485_v11 = vrot.slane %v2477_v57, %v3921_v34 }
 0x2b7   : > { %v3358_v22 = vpop.eup %3357  ;;  %v2193_v47 = vmul.bf16 %v2132_v9, %v3989_v39  ;;  %v2093_v24 = vadd.bf16 1065369472, %v3356_v19 }
 0x2b8   : > { %v3360_v59 = vpop.eup %3359  ;;  %v2223_v30 = vunpack.c.l.bf16 %v2183_v20  ;;  %v2233_v36 = vunpack.c.h.bf16 %v2183_v20  ;;  %v2184_v53 = vmul.bf16 %v2114_v21, %v3993_v42  ;;  %v2094_v41 = vadd.bf16 1065369472, %v3358_v22 }
 0x2b9   : > { %v2243_v48 = vunpack.c.l.bf16 %v2193_v47  ;;  %v2134_v29 = vmul.bf16 1065369472, %v3360_v59  ;;  %3365 = vrcp.bf16 %v2093_v24  ;;  %v2493_v54 = vcombine.low %v2485_v11, %v2492_v25 }
 0x2ba   : > { %v2399_v14 = vadd.f32 %v2233_v36, %v2223_v30  ;;  %v2224_v6 = vunpack.c.l.bf16 %v2184_v53  ;;  %v2234_v39 = vunpack.c.h.bf16 %v2184_v53  ;;  %3367 = vrcp.bf16 %v2094_v41 }
 0x2bb   : > { %v2194_v61 = vmul.bf16 %v2134_v29, %v3997_v45  ;;  %v2253_v37 = vunpack.c.h.bf16 %v2193_v47  ;;  %2511 = vst [vmem:[%s4036_s14] sm:$0xff] %v2493_v54 }
 0x2bc   : > { %v2400_v56 = vadd.f32 %v2399_v14, %v2243_v48  ;;  %v2412_v35 = vadd.f32 %v2234_v39, %v2224_v6 }
 0x2bd   : > { %v3362_v42 = vpop.eup %3361  ;;  %v2244_v38 = vunpack.c.l.bf16 %v2194_v61  ;;  %v2254_v23 = vunpack.c.h.bf16 %v2194_v61 }
 0x2be   : > { %v3364_v52 = vpop.eup %3363  ;;  %v2401_v18 = vadd.f32 %v2400_v56, %v2253_v37  ;;  %v2152_v44 = vmul.bf16 1065369472, %v3362_v42 }
 0x2bf   : > { %v2413_v57 = vadd.f32 %v2412_v35, %v2244_v38  ;;  %v2154_v0 = vmul.bf16 1065369472, %v3364_v52 }
 0x2c0   : > { %v2203_v49 = vmul.bf16 %v2152_v44, %v4006_v26 }
 0x2c1   : > { %v2414_v51 = vadd.f32 %v2413_v57, %v2254_v23  ;;  %v2204_v45 = vmul.bf16 %v2154_v0, %v4008_v12 }
 0x2c2   : > { %v2263_v62 = vunpack.c.l.bf16 %v2203_v49  ;;  %v2273_v2 = vunpack.c.h.bf16 %v2203_v49 }
 0x2c3   : > { %v2264_v1 = vunpack.c.l.bf16 %v2204_v45  ;;  %v2274_v31 = vunpack.c.h.bf16 %v2204_v45 }
 0x2c4   : > { %v3366_v33 = vpop.eup %3365  ;;  %v2402_v60 = vadd.f32 %v2401_v18, %v2263_v62 }
 0x2c5   : > { %v3368_v32 = vpop.eup %3367  ;;  %v2415_v55 = vadd.f32 %v2414_v51, %v2264_v1  ;;  %v2172_v15 = vmul.bf16 1065369472, %v3366_v33 }
 0x2c6   : > { %v2403_v43 = vadd.f32 %v2402_v60, %v2273_v2  ;;  %v2174_v7 = vmul.bf16 1065369472, %v3368_v32 }
 0x2c7   : > { %v2416_v3 = vadd.f32 %v2415_v55, %v2274_v31  ;;  %v2213_v4 = vmul.bf16 %v2172_v15, %v4016_v16 }
 0x2c8   : > { %v2214_v27 = vmul.bf16 %v2174_v7, %v4018_v63 }
 0x2c9   : > { %v2283_v26 = vunpack.c.l.bf16 %v2213_v4  ;;  %v2293_v46 = vunpack.c.h.bf16 %v2213_v4 }
 0x2ca   : > { %v2284_v17 = vunpack.c.l.bf16 %v2214_v27  ;;  %v2294_v58 = vunpack.c.h.bf16 %v2214_v27 }
 0x2cb   : > { %v2404_v12 = vadd.f32 %v2403_v43, %v2283_v26 }
 0x2cc   : > { %v2417_v5 = vadd.f32 %v2416_v3, %v2284_v17 }
 0x2cd   : > { %v2405_v50 = vadd.f32 %v2404_v12, %v2293_v46 }
 0x2ce   : > { %v2418_v8 = vadd.f32 %v2417_v5, %v2294_v58 }
 0x2cf   : > { %v2406_v10 = vrot.slane %v2405_v50, 4 }
 0x2d0   : > { %v2419_v40 = vrot.slane %v2418_v8, 4 }
 0x2d1   : > { %v2407_v28 = vadd.f32 %v2406_v10, %v2405_v50 }
 0x2d2   : > { %v2420_v9 = vadd.f32 %v2419_v40, %v2418_v8 }
 0x2d3   : > { %v2408_v19 = vrot.slane %v2407_v28, 2 }
 0x2d4   : > { %v2421_v20 = vrot.slane %v2420_v9, 2 }
 0x2d5   : > { %v2409_v21 = vadd.f32 %v2408_v19, %v2407_v28 }
 0x2d6   : > { %v2422_v16 = vadd.f32 %v2421_v20, %v2420_v9 }
 0x2d7   : > { %v2410_v63 = vrot.slane %v2409_v21, 1 }
 0x2d8   : > { %v2423_v22 = vrot.slane %v2422_v16, 1 }
 0x2d9   : > { %v2411_v47 = vadd.f32 %v2410_v63, %v2409_v21 }
 0x2da   : > { %v2424_v24 = vadd.f32 %v2423_v22, %v2422_v16 }
 0x2db   : > { %v2433_v25 = vmul.f32 0.015625, %v2411_v47 }
 0x2dc   : > { %v2434_v59 = vmul.f32 0.015625, %v2424_v24 }
 0x2de   : > { %v2494_v30 = vcombine.low %v2433_v25, %v2434_v59 }
 0x2e0   : > { %v2501_v36 = vrot.slane %v2494_v30, %v3921_v34 }
 0x2e2   : > { %v2508_v53 = vrot.slane %v2501_v36, %v3921_v34 }
 0x2e4   : > { %2516 = vst.msk [vmem:[%s4036_s14 + $0x8] sm:$0x3] %vm2514_vm1, %v2508_v53 }
 0x2e5   : > { %3410 = shalt.err (!%p3407_p7)
}
 0x2e6   : > { %s3411_s7 = scalar_lea.hbm %s4051_s25, 160  ;;  %s3415_s11 = scalar_lea.hbm %s4101_s5, 320 }
 0x2e7   : > { %p3412_p8 = scmp.ne.s32.totalorder %s4051_s25, %s3411_s7  ;;  %p3416_p1 = scmp.lt.u32.totalorder %s4051_s25, %s4101_s5 }
 0x2e8   : > { %p3417_p0 = scmp.lt.u32.totalorder %s3415_s11, %s3411_s7  ;;  %p3419_p6 = scmp.lt.u32.totalorder %s3411_s7, %s4051_s25 }
 0x2e9   : > { %p3413_p11 = pnand %p3412_p8, %p4112_p9 }
 0x2ea   : > { %p3418_p5 = por %p3417_p0, %p3416_p1 }
 0x2eb   : > { %p3414_p13 = pneg %p3413_p11 }
 0x2ec   : > { %p3420_p10 = por %p3419_p6, %p3418_p5 }
 0x2ee   : > { %p3421_p12 = pnand %p3420_p10, %p3414_p13 }
 0x2f0   : > { %3424 = shalt.err (!%p3421_p12)
}
 0x2f1   : > { %2874 = dma.vmem_to_hbm [thread:$0]  (%p4112_p9), %s4053_s16, 160, %s4051_s25, %s2518_s22  }
 0x2f2 PF: > { %p2886_p2 = scmp.ge.s32.totalorder %s3463_s21, 2  ;;  %s2544_s14 = sand.u32 1, %s3451_s18  }
 0x2f3   : > { %p4113_p3 = scmp.ne.s32.totalorder %s4106_s29, 0  ;;  %s2545_s15 = scalar_lea.sflag [#allocation4], %s2544_s14 }
 0x2f5   : > { %p2881_p4 = pnand %p2886_p2, %p4113_p3 }
 0x2f7   : > { %3446 = dma.done.wait (!%p2881_p4), %s2545_s15, 160  }
 0x2f8   : > { %3448 = vsyncadd (!%p2881_p4), %s2545_s15, 4294967136  ;;  %p16_p7 = scmp.ge.s32.totalorder %s3526_s24, 4   ;;  %s4114_s18 = smov %s3455_s19 }
 0x2f9   : > { %s4115_s19 = smov %s3459_s20  ;;  %s4116_s20 = smov %s3537_s27 }
 0x2fa   : > { %s4117_s21 = smov %s3526_s24  ;;  %18 = sbr.rel (!%p16_p7) target bundleno = 4 (0x4), region = 80 }
 0x301   :  { %2550 = vsyncpa [#allocation3], 1 }
 0x302   :  { %2552 = vsyncpa [#allocation3 + $0x1], 1 }
 0x303   :  { %2553 = vsyncpa [#allocation4], 1 }
 0x304   :  { %2555 = vsyncpa [#allocation4 + $0x1], 1 }

</bundles_post_ra>
